<compile_context>
chip_gen: v7x
topology: tpu7x:2x2x1
jax: 0.10.0
libtpu: 0.0.40
codegen_flags: <defaults>
</compile_context>

<pallas_src>
import jax
import jax.numpy as jnp
from jax import lax
from jax.experimental import pallas as pl
from jax.experimental.pallas import tpu as pltpu

EPS = 1e-5    # nn.LayerNorm default eps
LANE = 128    # TPU vreg lane width


# ------------------------------------------------------------------------------ kernels
def _layernorm(x, gamma, beta, mean_fn):
    mu = mean_fn(x)
    xc = x - mu
    var = mean_fn(xc * xc)
    return xc * lax.rsqrt(var + EPS) * gamma + beta


def _forward(doc, qry, wvo, bvo, g1, be1, w1, b1, w2, b2, w3, b3, g2, be2, mean_fn):
    # Attention with seq_len == 1: softmax weights are identically 1 -> one folded matmul.
    attn = jnp.dot(qry, wvo, preferred_element_type=jnp.float32) + bvo
    x1 = _layernorm(doc + attn, g1, be1, mean_fn)
    # Feed-forward network (Dropout(0.2) is identity in eval mode).
    h1 = jnp.maximum(jnp.dot(x1, w1, preferred_element_type=jnp.float32) + b1, 0.0)
    h2 = jnp.maximum(jnp.dot(h1, w2, preferred_element_type=jnp.float32) + b2, 0.0)
    ff = jnp.dot(h2, w3, preferred_element_type=jnp.float32) + b3
    return _layernorm(x1 + ff, g2, be2, mean_fn)


def _folded_kernel(doc_ref, qry_ref, mavg_ref, wvo_ref, bvo_ref, g1_ref, be1_ref,
                   w1_ref, b1_ref, w2_ref, b2_ref, w3_ref, b3_ref, g2_ref, be2_ref,
                   out_ref):
    # Lane-dense layout: `fold` logical rows per physical row; per-segment LayerNorm means
    # are a matmul with a block-diagonal averaging matrix (keeps reductions on the MXU).
    mean_fn = lambda t: jnp.dot(t, mavg_ref[...], preferred_element_type=jnp.float32)
    out_ref[...] = _forward(
        doc_ref[...], qry_ref[...], wvo_ref[...], bvo_ref[...], g1_ref[...], be1_ref[...],
        w1_ref[...], b1_ref[...], w2_ref[...], b2_ref[...], w3_ref[...], b3_ref[...],
        g2_ref[...], be2_ref[...], mean_fn).astype(out_ref.dtype)


def _plain_kernel(doc_ref, qry_ref, wvo_ref, bvo_ref, g1_ref, be1_ref,
                  w1_ref, b1_ref, w2_ref, b2_ref, w3_ref, b3_ref, g2_ref, be2_ref,
                  out_ref):
    mean_fn = lambda t: jnp.mean(t, axis=-1, keepdims=True)
    out_ref[...] = _forward(
        doc_ref[...], qry_ref[...], wvo_ref[...], bvo_ref[...], g1_ref[...], be1_ref[...],
        w1_ref[...], b1_ref[...], w2_ref[...], b2_ref[...], w3_ref[...], b3_ref[...],
        g2_ref[...], be2_ref[...], mean_fn).astype(out_ref.dtype)


# ------------------------------------------------------------------- parameter preparation
def prepare_params(params, num_heads=4):
    """One-time parameter preparation (call at model-init / parameter-load time).

    Folds the value+output projections (valid for seq_len == 1), transposes PyTorch
    (out, in) Linear weights to (in, out), and kron-expands everything into the
    lane-dense folded layout when E < 128.  `num_heads` only enters the (algebraically
    dead) score scaling; kept for API parity.
    """
    del num_heads
    E = params["wv"].shape[0]
    HID = params["w1"].shape[0]
    fold = LANE // E if (E < LANE and LANE % E == 0) else 1
    eye = jnp.eye(fold, dtype=jnp.float32)

    # attn_out = qry @ (Wv^T Wo^T) + (bv @ Wo^T + bo)   (softmax over length-1 axis == 1)
    wvo = params["wv"].T @ params["wo"].T                  # (E, E)
    bvo = params["bv"] @ params["wo"].T + params["bo"]     # (E,)

    def blkdiag(w_in_out):     # (in, out) -> block-diagonal (fold*in, fold*out)
        w_in_out = w_in_out.astype(jnp.float32)
        return jnp.kron(eye, w_in_out) if fold > 1 else w_in_out

    def row(v):                # (N,) -> (1, fold*N) sublane-broadcastable row
        v = v.astype(jnp.float32)
        return (jnp.tile(v, fold) if fold > 1 else v)[None, :]

    prepared = {
        "wvo": blkdiag(wvo), "bvo": row(bvo),
        "g1": row(params["g1"]), "be1": row(params["be1"]),
        "w1": blkdiag(params["w1"].T), "b1": row(params["b1"]),
        "w2": blkdiag(params["w2"].T), "b2": row(params["b2"]),
        "w3": blkdiag(params["w3"].T), "b3": row(params["b3"]),
        "g2": row(params["g2"]), "be2": row(params["be2"]),
    }
    if fold > 1:
        # Block-diagonal per-segment averaging matrix for matmul-based LayerNorm means.
        prepared["mavg"] = jnp.kron(eye, jnp.full((E, E), 1.0 / E, jnp.float32))
    meta = {"embedding_dim": E, "hidden_dim": HID, "fold": fold}
    return prepared, meta


# ------------------------------------------------------------------------------- wrapper
def query_adaptive_layer(doc, qry, prepared, meta, tile_rows=None):
    """doc, qry: (B, E) float32 (seq_len == 1 per the module's unsqueeze(1))."""
    assert doc.ndim == 2 and doc.shape == qry.shape, (doc.shape, qry.shape)
    B, E = doc.shape
    assert E == meta["embedding_dim"]
    fold = meta["fold"]
    W = fold * E                               # lane width of the folded layout
    HID = meta["hidden_dim"]
    fH = fold * HID

    # Fold `fold` batch rows into the lane axis so all tiles are lane-dense.
    Bp = pl.cdiv(B, fold) * fold
    if Bp != B:                                # tiny pad (< fold rows), only when needed
        doc = jnp.pad(doc, ((0, Bp - B), (0, 0)))
        qry = jnp.pad(qry, ((0, Bp - B), (0, 0)))
    R = Bp // fold                             # folded batch rows
    doc_f = doc.reshape(R, W)
    qry_f = qry.reshape(R, W)

    const_names = (["mavg"] if fold > 1 else []) + [
        "wvo", "bvo", "g1", "be1", "w1", "b1", "w2", "b2", "w3", "b3", "g2", "be2"]
    consts = [prepared[n] for n in const_names]
    weight_bytes = sum(int(a.size) * a.dtype.itemsize for a in consts)

    # ---- tile size: as large as the per-core VMEM budget allows, but >=2 grid steps ----
    try:
        vmem_cap = int(pltpu.get_tpu_info().vmem_capacity_bytes)   # 64 MiB/TC on v7x
    except Exception:
        vmem_cap = 64 << 20
    if tile_rows is None:
        stream_row_bytes = 3 * 2 * W * 4       # doc/qry/out streams, double-buffered
        budget = int(0.6 * vmem_cap) - 2 * weight_bytes
        tile_rows = max(8, min(2048, budget // stream_row_bytes))
    if R <= 8:
        tile_rows = R                          # single full block (== array dim)
    else:
        tile_rows = max(8, (int(tile_rows) // 8) * 8)
        two_step_cap = pl.cdiv(pl.cdiv(R, 2), 8) * 8   # >=2 steps -> both v7x cores busy
        tile_rows = min(tile_rows, two_step_cap, (R // 8) * 8)
    n_steps = pl.cdiv(R, tile_rows)

    # Scoped-VMEM limit from the actual footprint (weights counted double-buffered in case
    # the Buffered(1) request is ignored), with headroom for compiler scratch.
    vmem_need = 2 * weight_bytes + 3 * 2 * tile_rows * W * 4
    vmem_limit = int(min(int(0.9 * vmem_cap), max(32 << 20, int(1.25 * vmem_need))))

    batch_spec = pl.BlockSpec((tile_rows, W), lambda i: (i, 0))
    kernel = _folded_kernel if fold > 1 else _plain_kernel

    flops = 2 * R * (W * W + W * fH + fH * fH + fH * W + (4 * W * W if fold > 1 else 0))
    bytes_accessed = weight_bytes + 3 * R * W * 4

    def build(const_pipeline_mode):
        def const_spec(a):
            # Full block + constant index_map: fetched once, stays VMEM-resident.
            return pl.BlockSpec(a.shape, lambda i: (0, 0),
                                pipeline_mode=const_pipeline_mode)
        return pl.pallas_call(
            kernel,
            out_shape=jax.ShapeDtypeStruct((R, W), jnp.float32),
            grid=(n_steps,),
            in_specs=[batch_spec, batch_spec] + [const_spec(a) for a in consts],
            out_specs=pl.BlockSpec((tile_rows, W), lambda i: (i, 0)),
            compiler_params=pltpu.CompilerParams(
                dimension_semantics=("parallel",),
                vmem_limit_bytes=vmem_limit),
            cost_estimate=pl.CostEstimate(
                flops=flops, transcendentals=0, bytes_accessed=bytes_accessed),
        )

    try:
        # Constant-index weight operands only need a single VMEM buffer.
        out_f = build(pl.Buffered(1))(doc_f, qry_f, *consts)
    except Exception:
        # Fallback for jax versions without per-operand pipeline_mode support.
        out_f = build(None)(doc_f, qry_f, *consts)

    out = out_f.reshape(Bp, E)
    return out if Bp == B else out[:B]


# ----------------------------------------------------------------------------- reference
def reference(doc, qry, p, num_heads):
    """Pure-JAX transcription of the PyTorch forward pass (eval mode), full attention path."""
    B, E = doc.shape
    hd = E // num_heads
    scaling = float(hd) ** -0.5

    def lin(x, w, b):
        return x @ w.T + b

    def ln(x, g, b):
        mu = x.mean(-1, keepdims=True)
        var = ((x - mu) ** 2).mean(-1, keepdims=True)
        return (x - mu) / jnp.sqrt(var + EPS) * g + b

    d = doc[:, None, :]
    qe = qry[:, None, :]
    q = lin(d, p["wq"], p["bq"]).reshape(B, 1, num_heads, hd).transpose(0, 2, 1, 3)
    k = lin(qe, p["wk"], p["bk"]).reshape(B, 1, num_heads, hd).transpose(0, 2, 1, 3)
    v = lin(qe, p["wv"], p["bv"]).reshape(B, 1, num_heads, hd).transpose(0, 2, 1, 3)
    scores = (q @ jnp.swapaxes(k, -2, -1)) * scaling
    w = jax.nn.softmax(scores, axis=-1)
    a = (w @ v).transpose(0, 2, 1, 3).reshape(B, 1, E)
    a = lin(a, p["wo"], p["bo"])
    x1 = ln(d + a, p["g1"], p["be1"])
    h = jnp.maximum(lin(x1, p["w1"], p["b1"]), 0)
    h = jnp.maximum(lin(h, p["w2"], p["b2"]), 0)
    ff = lin(h, p["w3"], p["b3"])
    return ln(x1 + ff, p["g2"], p["be2"])[:, 0, :]


if __name__ == "__main__":
    B, E, HID, NUM_HEADS = 48, 32, 32, 4

    key = jax.random.PRNGKey(0)
    ks = jax.random.split(key, 20)

    def w(k, shape, scale=0.1):
        return (scale * jax.random.normal(k, shape)).astype(jnp.float32)

    params = {
        "wq": w(ks[0], (E, E)), "bq": w(ks[1], (E,)),
        "wk": w(ks[2], (E, E)), "bk": w(ks[3], (E,)),
        "wv": w(ks[4], (E, E)), "bv": w(ks[5], (E,)),
        "wo": w(ks[6], (E, E)), "bo": w(ks[7], (E,)),
        "g1": jnp.ones((E,), jnp.float32) + w(ks[8], (E,), 0.01),
        "be1": w(ks[9], (E,), 0.01),
        "w1": w(ks[10], (HID, E)), "b1": w(ks[11], (HID,)),
        "w2": w(ks[12], (HID, HID)), "b2": w(ks[13], (HID,)),
        "w3": w(ks[14], (E, HID)), "b3": w(ks[15], (E,)),
        "g2": jnp.ones((E,), jnp.float32) + w(ks[16], (E,), 0.01),
        "be2": w(ks[17], (E,), 0.01),
    }

    doc = w(ks[18], (B, E), 1.0)
    qry = w(ks[19], (B, E), 1.0)

    # One-time parameter preparation (fold Wv/Wo, transpose, kron to lane-dense layout).
    prepared, meta = prepare_params(params, num_heads=NUM_HEADS)

    # E=32 -> fold=4, lane width 128; B=48 -> 12 folded rows, 2 grid steps (ragged last).
    out = query_adaptive_layer(doc, qry, prepared, meta)
    out = jax.block_until_ready(out)

    ref = reference(doc, qry, params, NUM_HEADS)
    assert out.shape == (B, E), out.shape
    max_err = float(jnp.max(jnp.abs(out - ref)))
    assert jnp.allclose(out, ref, atol=2e-4, rtol=2e-4), max_err

    print("KERNEL_OK")
</pallas_src>

<mosaic_0001>
module attributes {stable_mosaic.version = 11 : i64} {
  func.func @_folded_kernel(%arg0: i32, %arg1: memref<8x128xf32, #tpu.memory_space<vmem>>, %arg2: memref<8x128xf32, #tpu.memory_space<vmem>>, %arg3: memref<128x128xf32, #tpu.memory_space<vmem>>, %arg4: memref<128x128xf32, #tpu.memory_space<vmem>>, %arg5: memref<1x128xf32, #tpu.memory_space<vmem>>, %arg6: memref<1x128xf32, #tpu.memory_space<vmem>>, %arg7: memref<1x128xf32, #tpu.memory_space<vmem>>, %arg8: memref<128x128xf32, #tpu.memory_space<vmem>>, %arg9: memref<1x128xf32, #tpu.memory_space<vmem>>, %arg10: memref<128x128xf32, #tpu.memory_space<vmem>>, %arg11: memref<1x128xf32, #tpu.memory_space<vmem>>, %arg12: memref<128x128xf32, #tpu.memory_space<vmem>>, %arg13: memref<1x128xf32, #tpu.memory_space<vmem>>, %arg14: memref<1x128xf32, #tpu.memory_space<vmem>>, %arg15: memref<1x128xf32, #tpu.memory_space<vmem>>, %arg16: memref<8x128xf32, #tpu.memory_space<vmem>>) attributes {dimension_semantics = [#tpu.dimension_semantics<parallel>], iteration_bounds = array<i64: 2>, scalar_prefetch = 0 : i64, scratch_operands = 0 : i64, tpu.core_type = #tpu.core_type<tc>, window_params = [{transform_indices = @transform_0, window_bounds = array<i64: 8, 128>}, {transform_indices = @transform_1, window_bounds = array<i64: 8, 128>}, {pipeline_mode = #tpu.pipeline_mode<synchronous>, transform_indices = @transform_2, window_bounds = array<i64: 128, 128>}, {pipeline_mode = #tpu.pipeline_mode<synchronous>, transform_indices = @transform_3, window_bounds = array<i64: 128, 128>}, {pipeline_mode = #tpu.pipeline_mode<synchronous>, transform_indices = @transform_4, window_bounds = array<i64: 1, 128>}, {pipeline_mode = #tpu.pipeline_mode<synchronous>, transform_indices = @transform_5, window_bounds = array<i64: 1, 128>}, {pipeline_mode = #tpu.pipeline_mode<synchronous>, transform_indices = @transform_6, window_bounds = array<i64: 1, 128>}, {pipeline_mode = #tpu.pipeline_mode<synchronous>, transform_indices = @transform_7, window_bounds = array<i64: 128, 128>}, {pipeline_mode = #tpu.pipeline_mode<synchronous>, transform_indices = @transform_8, window_bounds = array<i64: 1, 128>}, {pipeline_mode = #tpu.pipeline_mode<synchronous>, transform_indices = @transform_9, window_bounds = array<i64: 128, 128>}, {pipeline_mode = #tpu.pipeline_mode<synchronous>, transform_indices = @transform_10, window_bounds = array<i64: 1, 128>}, {pipeline_mode = #tpu.pipeline_mode<synchronous>, transform_indices = @transform_11, window_bounds = array<i64: 128, 128>}, {pipeline_mode = #tpu.pipeline_mode<synchronous>, transform_indices = @transform_12, window_bounds = array<i64: 1, 128>}, {pipeline_mode = #tpu.pipeline_mode<synchronous>, transform_indices = @transform_13, window_bounds = array<i64: 1, 128>}, {pipeline_mode = #tpu.pipeline_mode<synchronous>, transform_indices = @transform_14, window_bounds = array<i64: 1, 128>}, {transform_indices = @transform_15, window_bounds = array<i64: 8, 128>}]} {
    %c0 = arith.constant 0 : index
    %c0_0 = arith.constant 0 : index
    %0 = vector.load %arg1[%c0, %c0_0] : memref<8x128xf32, #tpu.memory_space<vmem>>, vector<8x128xf32>
    %c0_1 = arith.constant 0 : index
    %c0_2 = arith.constant 0 : index
    %1 = vector.load %arg2[%c0_1, %c0_2] : memref<8x128xf32, #tpu.memory_space<vmem>>, vector<8x128xf32>
    %c0_3 = arith.constant 0 : index
    %c0_4 = arith.constant 0 : index
    %2 = vector.load %arg4[%c0_3, %c0_4] : memref<128x128xf32, #tpu.memory_space<vmem>>, vector<128x128xf32>
    %c0_5 = arith.constant 0 : index
    %c0_6 = arith.constant 0 : index
    %3 = vector.load %arg5[%c0_5, %c0_6] : memref<1x128xf32, #tpu.memory_space<vmem>>, vector<1x128xf32>
    %c0_7 = arith.constant 0 : index
    %c0_8 = arith.constant 0 : index
    %4 = vector.load %arg6[%c0_7, %c0_8] : memref<1x128xf32, #tpu.memory_space<vmem>>, vector<1x128xf32>
    %c0_9 = arith.constant 0 : index
    %c0_10 = arith.constant 0 : index
    %5 = vector.load %arg7[%c0_9, %c0_10] : memref<1x128xf32, #tpu.memory_space<vmem>>, vector<1x128xf32>
    %c0_11 = arith.constant 0 : index
    %c0_12 = arith.constant 0 : index
    %6 = vector.load %arg8[%c0_11, %c0_12] : memref<128x128xf32, #tpu.memory_space<vmem>>, vector<128x128xf32>
    %c0_13 = arith.constant 0 : index
    %c0_14 = arith.constant 0 : index
    %7 = vector.load %arg9[%c0_13, %c0_14] : memref<1x128xf32, #tpu.memory_space<vmem>>, vector<1x128xf32>
    %c0_15 = arith.constant 0 : index
    %c0_16 = arith.constant 0 : index
    %8 = vector.load %arg10[%c0_15, %c0_16] : memref<128x128xf32, #tpu.memory_space<vmem>>, vector<128x128xf32>
    %c0_17 = arith.constant 0 : index
    %c0_18 = arith.constant 0 : index
    %9 = vector.load %arg11[%c0_17, %c0_18] : memref<1x128xf32, #tpu.memory_space<vmem>>, vector<1x128xf32>
    %c0_19 = arith.constant 0 : index
    %c0_20 = arith.constant 0 : index
    %10 = vector.load %arg12[%c0_19, %c0_20] : memref<128x128xf32, #tpu.memory_space<vmem>>, vector<128x128xf32>
    %c0_21 = arith.constant 0 : index
    %c0_22 = arith.constant 0 : index
    %11 = vector.load %arg13[%c0_21, %c0_22] : memref<1x128xf32, #tpu.memory_space<vmem>>, vector<1x128xf32>
    %c0_23 = arith.constant 0 : index
    %c0_24 = arith.constant 0 : index
    %12 = vector.load %arg14[%c0_23, %c0_24] : memref<1x128xf32, #tpu.memory_space<vmem>>, vector<1x128xf32>
    %c0_25 = arith.constant 0 : index
    %c0_26 = arith.constant 0 : index
    %13 = vector.load %arg15[%c0_25, %c0_26] : memref<1x128xf32, #tpu.memory_space<vmem>>, vector<1x128xf32>
    %cst = arith.constant dense<0.000000e+00> : vector<8x128xf32>
    %14 = tpu.matmul %1, %2, %cst {dimension_numbers = #tpu.dot_dimension_numbers<[1], [0], [0], [1], [0, 0, 1, 1], [], []>} : vector<8x128xf32>, vector<128x128xf32>, vector<8x128xf32> -> vector<8x128xf32>
    %15 = vector.broadcast %3 : vector<1x128xf32> to vector<8x128xf32>
    %16 = arith.addf %14, %15 : vector<8x128xf32>
    %17 = arith.addf %0, %16 : vector<8x128xf32>
    %c0_27 = arith.constant 0 : index
    %c0_28 = arith.constant 0 : index
    %18 = vector.load %arg3[%c0_27, %c0_28] : memref<128x128xf32, #tpu.memory_space<vmem>>, vector<128x128xf32>
    %cst_29 = arith.constant dense<0.000000e+00> : vector<8x128xf32>
    %19 = tpu.matmul %17, %18, %cst_29 {dimension_numbers = #tpu.dot_dimension_numbers<[1], [0], [0], [1], [0, 0, 1, 1], [], []>} : vector<8x128xf32>, vector<128x128xf32>, vector<8x128xf32> -> vector<8x128xf32>
    %20 = arith.subf %17, %19 : vector<8x128xf32>
    %21 = arith.mulf %20, %20 : vector<8x128xf32>
    %c0_30 = arith.constant 0 : index
    %c0_31 = arith.constant 0 : index
    %22 = vector.load %arg3[%c0_30, %c0_31] : memref<128x128xf32, #tpu.memory_space<vmem>>, vector<128x128xf32>
    %cst_32 = arith.constant dense<0.000000e+00> : vector<8x128xf32>
    %23 = tpu.matmul %21, %22, %cst_32 {dimension_numbers = #tpu.dot_dimension_numbers<[1], [0], [0], [1], [0, 0, 1, 1], [], []>} : vector<8x128xf32>, vector<128x128xf32>, vector<8x128xf32> -> vector<8x128xf32>
    %cst_33 = arith.constant 9.99999974E-6 : f32
    %24 = vector.broadcast %cst_33 : f32 to vector<8x128xf32>
    %25 = arith.addf %23, %24 : vector<8x128xf32>
    %26 = math.rsqrt %25 : vector<8x128xf32>
    %27 = arith.mulf %20, %26 : vector<8x128xf32>
    %28 = vector.broadcast %4 : vector<1x128xf32> to vector<8x128xf32>
    %29 = arith.mulf %27, %28 : vector<8x128xf32>
    %30 = vector.broadcast %5 : vector<1x128xf32> to vector<8x128xf32>
    %31 = arith.addf %29, %30 : vector<8x128xf32>
    %cst_34 = arith.constant dense<0.000000e+00> : vector<8x128xf32>
    %32 = tpu.matmul %31, %6, %cst_34 {dimension_numbers = #tpu.dot_dimension_numbers<[1], [0], [0], [1], [0, 0, 1, 1], [], []>} : vector<8x128xf32>, vector<128x128xf32>, vector<8x128xf32> -> vector<8x128xf32>
    %33 = vector.broadcast %7 : vector<1x128xf32> to vector<8x128xf32>
    %34 = arith.addf %32, %33 : vector<8x128xf32>
    %cst_35 = arith.constant 0.000000e+00 : f32
    %35 = vector.broadcast %cst_35 : f32 to vector<8x128xf32>
    %36 = arith.maximumf %34, %35 : vector<8x128xf32>
    %cst_36 = arith.constant dense<0.000000e+00> : vector<8x128xf32>
    %37 = tpu.matmul %36, %8, %cst_36 {dimension_numbers = #tpu.dot_dimension_numbers<[1], [0], [0], [1], [0, 0, 1, 1], [], []>} : vector<8x128xf32>, vector<128x128xf32>, vector<8x128xf32> -> vector<8x128xf32>
    %38 = vector.broadcast %9 : vector<1x128xf32> to vector<8x128xf32>
    %39 = arith.addf %37, %38 : vector<8x128xf32>
    %cst_37 = arith.constant 0.000000e+00 : f32
    %40 = vector.broadcast %cst_37 : f32 to vector<8x128xf32>
    %41 = arith.maximumf %39, %40 : vector<8x128xf32>
    %cst_38 = arith.constant dense<0.000000e+00> : vector<8x128xf32>
    %42 = tpu.matmul %41, %10, %cst_38 {dimension_numbers = #tpu.dot_dimension_numbers<[1], [0], [0], [1], [0, 0, 1, 1], [], []>} : vector<8x128xf32>, vector<128x128xf32>, vector<8x128xf32> -> vector<8x128xf32>
    %43 = vector.broadcast %11 : vector<1x128xf32> to vector<8x128xf32>
    %44 = arith.addf %42, %43 : vector<8x128xf32>
    %45 = arith.addf %31, %44 : vector<8x128xf32>
    %c0_39 = arith.constant 0 : index
    %c0_40 = arith.constant 0 : index
    %46 = vector.load %arg3[%c0_39, %c0_40] : memref<128x128xf32, #tpu.memory_space<vmem>>, vector<128x128xf32>
    %cst_41 = arith.constant dense<0.000000e+00> : vector<8x128xf32>
    %47 = tpu.matmul %45, %46, %cst_41 {dimension_numbers = #tpu.dot_dimension_numbers<[1], [0], [0], [1], [0, 0, 1, 1], [], []>} : vector<8x128xf32>, vector<128x128xf32>, vector<8x128xf32> -> vector<8x128xf32>
    %48 = arith.subf %45, %47 : vector<8x128xf32>
    %49 = arith.mulf %48, %48 : vector<8x128xf32>
    %c0_42 = arith.constant 0 : index
    %c0_43 = arith.constant 0 : index
    %50 = vector.load %arg3[%c0_42, %c0_43] : memref<128x128xf32, #tpu.memory_space<vmem>>, vector<128x128xf32>
    %cst_44 = arith.constant dense<0.000000e+00> : vector<8x128xf32>
    %51 = tpu.matmul %49, %50, %cst_44 {dimension_numbers = #tpu.dot_dimension_numbers<[1], [0], [0], [1], [0, 0, 1, 1], [], []>} : vector<8x128xf32>, vector<128x128xf32>, vector<8x128xf32> -> vector<8x128xf32>
    %cst_45 = arith.constant 9.99999974E-6 : f32
    %52 = vector.broadcast %cst_45 : f32 to vector<8x128xf32>
    %53 = arith.addf %51, %52 : vector<8x128xf32>
    %54 = math.rsqrt %53 : vector<8x128xf32>
    %55 = arith.mulf %48, %54 : vector<8x128xf32>
    %56 = vector.broadcast %12 : vector<1x128xf32> to vector<8x128xf32>
    %57 = arith.mulf %55, %56 : vector<8x128xf32>
    %58 = vector.broadcast %13 : vector<1x128xf32> to vector<8x128xf32>
    %59 = arith.addf %57, %58 : vector<8x128xf32>
    %c0_46 = arith.constant 0 : index
    %c0_47 = arith.constant 0 : index
    %60 = vector.load %arg16[%c0_46, %c0_47] : memref<8x128xf32, #tpu.memory_space<vmem>>, vector<8x128xf32>
    tpu.vector_store %arg16[%c0_46, %c0_47], %59 {strides = array<i32>} : memref<8x128xf32, #tpu.memory_space<vmem>>, vector<8x128xf32>,
    return
  }
  func.func @transform_0(%arg0: i32) -> (i32, i32) {
    %c0_i32 = arith.constant 0 : i32
    %c0_i32_0 = arith.constant 0 : i32
    return %arg0, %c0_i32 : i32, i32
  }
  func.func @transform_1(%arg0: i32) -> (i32, i32) {
    %c0_i32 = arith.constant 0 : i32
    %c0_i32_0 = arith.constant 0 : i32
    return %arg0, %c0_i32 : i32, i32
  }
  func.func @transform_2(%arg0: i32) -> (i32, i32) {
    %c0_i32 = arith.constant 0 : i32
    %c0_i32_0 = arith.constant 0 : i32
    %c0_i32_1 = arith.constant 0 : i32
    return %c0_i32, %c0_i32_0 : i32, i32
  }
  func.func @transform_3(%arg0: i32) -> (i32, i32) {
    %c0_i32 = arith.constant 0 : i32
    %c0_i32_0 = arith.constant 0 : i32
    %c0_i32_1 = arith.constant 0 : i32
    return %c0_i32, %c0_i32_0 : i32, i32
  }
  func.func @transform_4(%arg0: i32) -> (i32, i32) {
    %c0_i32 = arith.constant 0 : i32
    %c0_i32_0 = arith.constant 0 : i32
    %c0_i32_1 = arith.constant 0 : i32
    return %c0_i32, %c0_i32_0 : i32, i32
  }
  func.func @transform_5(%arg0: i32) -> (i32, i32) {
    %c0_i32 = arith.constant 0 : i32
    %c0_i32_0 = arith.constant 0 : i32
    %c0_i32_1 = arith.constant 0 : i32
    return %c0_i32, %c0_i32_0 : i32, i32
  }
  func.func @transform_6(%arg0: i32) -> (i32, i32) {
    %c0_i32 = arith.constant 0 : i32
    %c0_i32_0 = arith.constant 0 : i32
    %c0_i32_1 = arith.constant 0 : i32
    return %c0_i32, %c0_i32_0 : i32, i32
  }
  func.func @transform_7(%arg0: i32) -> (i32, i32) {
    %c0_i32 = arith.constant 0 : i32
    %c0_i32_0 = arith.constant 0 : i32
    %c0_i32_1 = arith.constant 0 : i32
    return %c0_i32, %c0_i32_0 : i32, i32
  }
  func.func @transform_8(%arg0: i32) -> (i32, i32) {
    %c0_i32 = arith.constant 0 : i32
    %c0_i32_0 = arith.constant 0 : i32
    %c0_i32_1 = arith.constant 0 : i32
    return %c0_i32, %c0_i32_0 : i32, i32
  }
  func.func @transform_9(%arg0: i32) -> (i32, i32) {
    %c0_i32 = arith.constant 0 : i32
    %c0_i32_0 = arith.constant 0 : i32
    %c0_i32_1 = arith.constant 0 : i32
    return %c0_i32, %c0_i32_0 : i32, i32
  }
  func.func @transform_10(%arg0: i32) -> (i32, i32) {
    %c0_i32 = arith.constant 0 : i32
    %c0_i32_0 = arith.constant 0 : i32
    %c0_i32_1 = arith.constant 0 : i32
    return %c0_i32, %c0_i32_0 : i32, i32
  }
  func.func @transform_11(%arg0: i32) -> (i32, i32) {
    %c0_i32 = arith.constant 0 : i32
    %c0_i32_0 = arith.constant 0 : i32
    %c0_i32_1 = arith.constant 0 : i32
    return %c0_i32, %c0_i32_0 : i32, i32
  }
  func.func @transform_12(%arg0: i32) -> (i32, i32) {
    %c0_i32 = arith.constant 0 : i32
    %c0_i32_0 = arith.constant 0 : i32
    %c0_i32_1 = arith.constant 0 : i32
    return %c0_i32, %c0_i32_0 : i32, i32
  }
  func.func @transform_13(%arg0: i32) -> (i32, i32) {
    %c0_i32 = arith.constant 0 : i32
    %c0_i32_0 = arith.constant 0 : i32
    %c0_i32_1 = arith.constant 0 : i32
    return %c0_i32, %c0_i32_0 : i32, i32
  }
  func.func @transform_14(%arg0: i32) -> (i32, i32) {
    %c0_i32 = arith.constant 0 : i32
    %c0_i32_0 = arith.constant 0 : i32
    %c0_i32_1 = arith.constant 0 : i32
    return %c0_i32, %c0_i32_0 : i32, i32
  }
  func.func @transform_15(%arg0: i32) -> (i32, i32) {
    %c0_i32 = arith.constant 0 : i32
    %c0_i32_0 = arith.constant 0 : i32
    return %arg0, %c0_i32 : i32, i32
  }
}

module attributes {stable_mosaic.version = 11 : i64} {
  func.func @_folded_kernel(%arg0: i32, %arg1: memref<8x128xf32, #tpu.memory_space<vmem>>, %arg2: memref<8x128xf32, #tpu.memory_space<vmem>>, %arg3: memref<128x128xf32, #tpu.memory_space<vmem>>, %arg4: memref<128x128xf32, #tpu.memory_space<vmem>>, %arg5: memref<1x128xf32, #tpu.memory_space<vmem>>, %arg6: memref<1x128xf32, #tpu.memory_space<vmem>>, %arg7: memref<1x128xf32, #tpu.memory_space<vmem>>, %arg8: memref<128x128xf32, #tpu.memory_space<vmem>>, %arg9: memref<1x128xf32, #tpu.memory_space<vmem>>, %arg10: memref<128x128xf32, #tpu.memory_space<vmem>>, %arg11: memref<1x128xf32, #tpu.memory_space<vmem>>, %arg12: memref<128x128xf32, #tpu.memory_space<vmem>>, %arg13: memref<1x128xf32, #tpu.memory_space<vmem>>, %arg14: memref<1x128xf32, #tpu.memory_space<vmem>>, %arg15: memref<1x128xf32, #tpu.memory_space<vmem>>, %arg16: memref<8x128xf32, #tpu.memory_space<vmem>>) attributes {dimension_semantics = [#tpu.dimension_semantics<parallel>], iteration_bounds = array<i64: 2>, scalar_prefetch = 0 : i64, scratch_operands = 0 : i64, tpu.core_type = #tpu.core_type<tc>, window_params = [{transform_indices = @transform_0, window_bounds = array<i64: 8, 128>}, {transform_indices = @transform_1, window_bounds = array<i64: 8, 128>}, {pipeline_mode = #tpu.pipeline_mode<synchronous>, transform_indices = @transform_2, window_bounds = array<i64: 128, 128>}, {pipeline_mode = #tpu.pipeline_mode<synchronous>, transform_indices = @transform_3, window_bounds = array<i64: 128, 128>}, {pipeline_mode = #tpu.pipeline_mode<synchronous>, transform_indices = @transform_4, window_bounds = array<i64: 1, 128>}, {pipeline_mode = #tpu.pipeline_mode<synchronous>, transform_indices = @transform_5, window_bounds = array<i64: 1, 128>}, {pipeline_mode = #tpu.pipeline_mode<synchronous>, transform_indices = @transform_6, window_bounds = array<i64: 1, 128>}, {pipeline_mode = #tpu.pipeline_mode<synchronous>, transform_indices = @transform_7, window_bounds = array<i64: 128, 128>}, {pipeline_mode = #tpu.pipeline_mode<synchronous>, transform_indices = @transform_8, window_bounds = array<i64: 1, 128>}, {pipeline_mode = #tpu.pipeline_mode<synchronous>, transform_indices = @transform_9, window_bounds = array<i64: 128, 128>}, {pipeline_mode = #tpu.pipeline_mode<synchronous>, transform_indices = @transform_10, window_bounds = array<i64: 1, 128>}, {pipeline_mode = #tpu.pipeline_mode<synchronous>, transform_indices = @transform_11, window_bounds = array<i64: 128, 128>}, {pipeline_mode = #tpu.pipeline_mode<synchronous>, transform_indices = @transform_12, window_bounds = array<i64: 1, 128>}, {pipeline_mode = #tpu.pipeline_mode<synchronous>, transform_indices = @transform_13, window_bounds = array<i64: 1, 128>}, {pipeline_mode = #tpu.pipeline_mode<synchronous>, transform_indices = @transform_14, window_bounds = array<i64: 1, 128>}, {transform_indices = @transform_15, window_bounds = array<i64: 8, 128>}]} {
    %c0 = arith.constant 0 : index
    %c0_0 = arith.constant 0 : index
    %0 = vector.load %arg1[%c0, %c0_0] : memref<8x128xf32, #tpu.memory_space<vmem>>, vector<8x128xf32>
    %c0_1 = arith.constant 0 : index
    %c0_2 = arith.constant 0 : index
    %1 = vector.load %arg2[%c0_1, %c0_2] : memref<8x128xf32, #tpu.memory_space<vmem>>, vector<8x128xf32>
    %c0_3 = arith.constant 0 : index
    %c0_4 = arith.constant 0 : index
    %2 = vector.load %arg4[%c0_3, %c0_4] : memref<128x128xf32, #tpu.memory_space<vmem>>, vector<128x128xf32>
    %c0_5 = arith.constant 0 : index
    %c0_6 = arith.constant 0 : index
    %3 = vector.load %arg5[%c0_5, %c0_6] : memref<1x128xf32, #tpu.memory_space<vmem>>, vector<1x128xf32>
    %c0_7 = arith.constant 0 : index
    %c0_8 = arith.constant 0 : index
    %4 = vector.load %arg6[%c0_7, %c0_8] : memref<1x128xf32, #tpu.memory_space<vmem>>, vector<1x128xf32>
    %c0_9 = arith.constant 0 : index
    %c0_10 = arith.constant 0 : index
    %5 = vector.load %arg7[%c0_9, %c0_10] : memref<1x128xf32, #tpu.memory_space<vmem>>, vector<1x128xf32>
    %c0_11 = arith.constant 0 : index
    %c0_12 = arith.constant 0 : index
    %6 = vector.load %arg8[%c0_11, %c0_12] : memref<128x128xf32, #tpu.memory_space<vmem>>, vector<128x128xf32>
    %c0_13 = arith.constant 0 : index
    %c0_14 = arith.constant 0 : index
    %7 = vector.load %arg9[%c0_13, %c0_14] : memref<1x128xf32, #tpu.memory_space<vmem>>, vector<1x128xf32>
    %c0_15 = arith.constant 0 : index
    %c0_16 = arith.constant 0 : index
    %8 = vector.load %arg10[%c0_15, %c0_16] : memref<128x128xf32, #tpu.memory_space<vmem>>, vector<128x128xf32>
    %c0_17 = arith.constant 0 : index
    %c0_18 = arith.constant 0 : index
    %9 = vector.load %arg11[%c0_17, %c0_18] : memref<1x128xf32, #tpu.memory_space<vmem>>, vector<1x128xf32>
    %c0_19 = arith.constant 0 : index
    %c0_20 = arith.constant 0 : index
    %10 = vector.load %arg12[%c0_19, %c0_20] : memref<128x128xf32, #tpu.memory_space<vmem>>, vector<128x128xf32>
    %c0_21 = arith.constant 0 : index
    %c0_22 = arith.constant 0 : index
    %11 = vector.load %arg13[%c0_21, %c0_22] : memref<1x128xf32, #tpu.memory_space<vmem>>, vector<1x128xf32>
    %c0_23 = arith.constant 0 : index
    %c0_24 = arith.constant 0 : index
    %12 = vector.load %arg14[%c0_23, %c0_24] : memref<1x128xf32, #tpu.memory_space<vmem>>, vector<1x128xf32>
    %c0_25 = arith.constant 0 : index
    %c0_26 = arith.constant 0 : index
    %13 = vector.load %arg15[%c0_25, %c0_26] : memref<1x128xf32, #tpu.memory_space<vmem>>, vector<1x128xf32>
    %cst = arith.constant dense<0.000000e+00> : vector<8x128xf32>
    %14 = tpu.matmul %1, %2, %cst {dimension_numbers = #tpu.dot_dimension_numbers<[1], [0], [0], [1], [0, 0, 1, 1], [], []>} : vector<8x128xf32>, vector<128x128xf32>, vector<8x128xf32> -> vector<8x128xf32>
    %15 = vector.broadcast %3 : vector<1x128xf32> to vector<8x128xf32>
    %16 = arith.addf %14, %15 : vector<8x128xf32>
    %17 = arith.addf %0, %16 : vector<8x128xf32>
    %c0_27 = arith.constant 0 : index
    %c0_28 = arith.constant 0 : index
    %18 = vector.load %arg3[%c0_27, %c0_28] : memref<128x128xf32, #tpu.memory_space<vmem>>, vector<128x128xf32>
    %cst_29 = arith.constant dense<0.000000e+00> : vector<8x128xf32>
    %19 = tpu.matmul %17, %18, %cst_29 {dimension_numbers = #tpu.dot_dimension_numbers<[1], [0], [0], [1], [0, 0, 1, 1], [], []>} : vector<8x128xf32>, vector<128x128xf32>, vector<8x128xf32> -> vector<8x128xf32>
    %20 = arith.subf %17, %19 : vector<8x128xf32>
    %21 = arith.mulf %20, %20 : vector<8x128xf32>
    %c0_30 = arith.constant 0 : index
    %c0_31 = arith.constant 0 : index
    %22 = vector.load %arg3[%c0_30, %c0_31] : memref<128x128xf32, #tpu.memory_space<vmem>>, vector<128x128xf32>
    %cst_32 = arith.constant dense<0.000000e+00> : vector<8x128xf32>
    %23 = tpu.matmul %21, %22, %cst_32 {dimension_numbers = #tpu.dot_dimension_numbers<[1], [0], [0], [1], [0, 0, 1, 1], [], []>} : vector<8x128xf32>, vector<128x128xf32>, vector<8x128xf32> -> vector<8x128xf32>
    %cst_33 = arith.constant 9.99999974E-6 : f32
    %24 = vector.broadcast %cst_33 : f32 to vector<8x128xf32>
    %25 = arith.addf %23, %24 : vector<8x128xf32>
    %26 = math.rsqrt %25 : vector<8x128xf32>
    %27 = arith.mulf %20, %26 : vector<8x128xf32>
    %28 = vector.broadcast %4 : vector<1x128xf32> to vector<8x128xf32>
    %29 = arith.mulf %27, %28 : vector<8x128xf32>
    %30 = vector.broadcast %5 : vector<1x128xf32> to vector<8x128xf32>
    %31 = arith.addf %29, %30 : vector<8x128xf32>
    %cst_34 = arith.constant dense<0.000000e+00> : vector<8x128xf32>
    %32 = tpu.matmul %31, %6, %cst_34 {dimension_numbers = #tpu.dot_dimension_numbers<[1], [0], [0], [1], [0, 0, 1, 1], [], []>} : vector<8x128xf32>, vector<128x128xf32>, vector<8x128xf32> -> vector<8x128xf32>
    %33 = vector.broadcast %7 : vector<1x128xf32> to vector<8x128xf32>
    %34 = arith.addf %32, %33 : vector<8x128xf32>
    %cst_35 = arith.constant 0.000000e+00 : f32
    %35 = vector.broadcast %cst_35 : f32 to vector<8x128xf32>
    %36 = arith.maximumf %34, %35 : vector<8x128xf32>
    %cst_36 = arith.constant dense<0.000000e+00> : vector<8x128xf32>
    %37 = tpu.matmul %36, %8, %cst_36 {dimension_numbers = #tpu.dot_dimension_numbers<[1], [0], [0], [1], [0, 0, 1, 1], [], []>} : vector<8x128xf32>, vector<128x128xf32>, vector<8x128xf32> -> vector<8x128xf32>
    %38 = vector.broadcast %9 : vector<1x128xf32> to vector<8x128xf32>
    %39 = arith.addf %37, %38 : vector<8x128xf32>
    %cst_37 = arith.constant 0.000000e+00 : f32
    %40 = vector.broadcast %cst_37 : f32 to vector<8x128xf32>
    %41 = arith.maximumf %39, %40 : vector<8x128xf32>
    %cst_38 = arith.constant dense<0.000000e+00> : vector<8x128xf32>
    %42 = tpu.matmul %41, %10, %cst_38 {dimension_numbers = #tpu.dot_dimension_numbers<[1], [0], [0], [1], [0, 0, 1, 1], [], []>} : vector<8x128xf32>, vector<128x128xf32>, vector<8x128xf32> -> vector<8x128xf32>
    %43 = vector.broadcast %11 : vector<1x128xf32> to vector<8x128xf32>
    %44 = arith.addf %42, %43 : vector<8x128xf32>
    %45 = arith.addf %31, %44 : vector<8x128xf32>
    %c0_39 = arith.constant 0 : index
    %c0_40 = arith.constant 0 : index
    %46 = vector.load %arg3[%c0_39, %c0_40] : memref<128x128xf32, #tpu.memory_space<vmem>>, vector<128x128xf32>
    %cst_41 = arith.constant dense<0.000000e+00> : vector<8x128xf32>
    %47 = tpu.matmul %45, %46, %cst_41 {dimension_numbers = #tpu.dot_dimension_numbers<[1], [0], [0], [1], [0, 0, 1, 1], [], []>} : vector<8x128xf32>, vector<128x128xf32>, vector<8x128xf32> -> vector<8x128xf32>
    %48 = arith.subf %45, %47 : vector<8x128xf32>
    %49 = arith.mulf %48, %48 : vector<8x128xf32>
    %c0_42 = arith.constant 0 : index
    %c0_43 = arith.constant 0 : index
    %50 = vector.load %arg3[%c0_42, %c0_43] : memref<128x128xf32, #tpu.memory_space<vmem>>, vector<128x128xf32>
    %cst_44 = arith.constant dense<0.000000e+00> : vector<8x128xf32>
    %51 = tpu.matmul %49, %50, %cst_44 {dimension_numbers = #tpu.dot_dimension_numbers<[1], [0], [0], [1], [0, 0, 1, 1], [], []>} : vector<8x128xf32>, vector<128x128xf32>, vector<8x128xf32> -> vector<8x128xf32>
    %cst_45 = arith.constant 9.99999974E-6 : f32
    %52 = vector.broadcast %cst_45 : f32 to vector<8x128xf32>
    %53 = arith.addf %51, %52 : vector<8x128xf32>
    %54 = math.rsqrt %53 : vector<8x128xf32>
    %55 = arith.mulf %48, %54 : vector<8x128xf32>
    %56 = vector.broadcast %12 : vector<1x128xf32> to vector<8x128xf32>
    %57 = arith.mulf %55, %56 : vector<8x128xf32>
    %58 = vector.broadcast %13 : vector<1x128xf32> to vector<8x128xf32>
    %59 = arith.addf %57, %58 : vector<8x128xf32>
    %c0_46 = arith.constant 0 : index
    %c0_47 = arith.constant 0 : index
    %60 = vector.load %arg16[%c0_46, %c0_47] : memref<8x128xf32, #tpu.memory_space<vmem>>, vector<8x128xf32>
    tpu.vector_store %arg16[%c0_46, %c0_47], %59 {strides = array<i32>} : memref<8x128xf32, #tpu.memory_space<vmem>>, vector<8x128xf32>,
    return
  }
  func.func @transform_0(%arg0: i32) -> (i32, i32) {
    %c0_i32 = arith.constant 0 : i32
    %c0_i32_0 = arith.constant 0 : i32
    return %arg0, %c0_i32 : i32, i32
  }
  func.func @transform_1(%arg0: i32) -> (i32, i32) {
    %c0_i32 = arith.constant 0 : i32
    %c0_i32_0 = arith.constant 0 : i32
    return %arg0, %c0_i32 : i32, i32
  }
  func.func @transform_2(%arg0: i32) -> (i32, i32) {
    %c0_i32 = arith.constant 0 : i32
    %c0_i32_0 = arith.constant 0 : i32
    %c0_i32_1 = arith.constant 0 : i32
    return %c0_i32, %c0_i32_0 : i32, i32
  }
  func.func @transform_3(%arg0: i32) -> (i32, i32) {
    %c0_i32 = arith.constant 0 : i32
    %c0_i32_0 = arith.constant 0 : i32
    %c0_i32_1 = arith.constant 0 : i32
    return %c0_i32, %c0_i32_0 : i32, i32
  }
  func.func @transform_4(%arg0: i32) -> (i32, i32) {
    %c0_i32 = arith.constant 0 : i32
    %c0_i32_0 = arith.constant 0 : i32
    %c0_i32_1 = arith.constant 0 : i32
    return %c0_i32, %c0_i32_0 : i32, i32
  }
  func.func @transform_5(%arg0: i32) -> (i32, i32) {
    %c0_i32 = arith.constant 0 : i32
    %c0_i32_0 = arith.constant 0 : i32
    %c0_i32_1 = arith.constant 0 : i32
    return %c0_i32, %c0_i32_0 : i32, i32
  }
  func.func @transform_6(%arg0: i32) -> (i32, i32) {
    %c0_i32 = arith.constant 0 : i32
    %c0_i32_0 = arith.constant 0 : i32
    %c0_i32_1 = arith.constant 0 : i32
    return %c0_i32, %c0_i32_0 : i32, i32
  }
  func.func @transform_7(%arg0: i32) -> (i32, i32) {
    %c0_i32 = arith.constant 0 : i32
    %c0_i32_0 = arith.constant 0 : i32
    %c0_i32_1 = arith.constant 0 : i32
    return %c0_i32, %c0_i32_0 : i32, i32
  }
  func.func @transform_8(%arg0: i32) -> (i32, i32) {
    %c0_i32 = arith.constant 0 : i32
    %c0_i32_0 = arith.constant 0 : i32
    %c0_i32_1 = arith.constant 0 : i32
    return %c0_i32, %c0_i32_0 : i32, i32
  }
  func.func @transform_9(%arg0: i32) -> (i32, i32) {
    %c0_i32 = arith.constant 0 : i32
    %c0_i32_0 = arith.constant 0 : i32
    %c0_i32_1 = arith.constant 0 : i32
    return %c0_i32, %c0_i32_0 : i32, i32
  }
  func.func @transform_10(%arg0: i32) -> (i32, i32) {
    %c0_i32 = arith.constant 0 : i32
    %c0_i32_0 = arith.constant 0 : i32
    %c0_i32_1 = arith.constant 0 : i32
    return %c0_i32, %c0_i32_0 : i32, i32
  }
  func.func @transform_11(%arg0: i32) -> (i32, i32) {
    %c0_i32 = arith.constant 0 : i32
    %c0_i32_0 = arith.constant 0 : i32
    %c0_i32_1 = arith.constant 0 : i32
    return %c0_i32, %c0_i32_0 : i32, i32
  }
  func.func @transform_12(%arg0: i32) -> (i32, i32) {
    %c0_i32 = arith.constant 0 : i32
    %c0_i32_0 = arith.constant 0 : i32
    %c0_i32_1 = arith.constant 0 : i32
    return %c0_i32, %c0_i32_0 : i32, i32
  }
  func.func @transform_13(%arg0: i32) -> (i32, i32) {
    %c0_i32 = arith.constant 0 : i32
    %c0_i32_0 = arith.constant 0 : i32
    %c0_i32_1 = arith.constant 0 : i32
    return %c0_i32, %c0_i32_0 : i32, i32
  }
  func.func @transform_14(%arg0: i32) -> (i32, i32) {
    %c0_i32 = arith.constant 0 : i32
    %c0_i32_0 = arith.constant 0 : i32
    %c0_i32_1 = arith.constant 0 : i32
    return %c0_i32, %c0_i32_0 : i32, i32
  }
  func.func @transform_15(%arg0: i32) -> (i32, i32) {
    %c0_i32 = arith.constant 0 : i32
    %c0_i32_0 = arith.constant 0 : i32
    return %arg0, %c0_i32 : i32, i32
  }
}

</mosaic_0001>

<bundles_post_ra>
// kernel: tpu_custom_call.1
= control target key start
LH: loop header
LB: loop body
LE: loop exit
PB: predicated region body
PF: predicated region fallthrough
CT: control target
= control target key end

     0   :  { %s3132_s0 = inlined_call_operand.hbm [shape: f32[12,128], index: 0, kind: input, shape index: {}]   ;;  %s3133_s1 = inlined_call_operand.hbm [shape: f32[12,128], index: 1, kind: input, shape index: {}]   ;;  %s3134_s2 = inlined_call_operand.hbm [shape: f32[128,128], index: 2, kind: input, shape index: {}]   ;;  %s3135_s3 = inlined_call_operand.hbm [shape: f32[128,128], index: 3, kind: input, shape index: {}]   ;;  %s3136_s4 = inlined_call_operand.vmem [shape: f32[1,128], index: 4, kind: input, shape index: {}]   ;;  %s3137_s5 = inlined_call_operand.vmem [shape: f32[1,128], index: 5, kind: input, shape index: {}]   ;;  %s3138_s6 = inlined_call_operand.vmem [shape: f32[1,128], index: 6, kind: input, shape index: {}]   ;;  %s3139_s7 = inlined_call_operand.hbm [shape: f32[128,128], index: 7, kind: input, shape index: {}]   ;;  %s3140_s8 = inlined_call_operand.vmem [shape: f32[1,128], index: 8, kind: input, shape index: {}]   ;;  %s3141_s9 = inlined_call_operand.hbm [shape: f32[128,128], index: 9, kind: input, shape index: {}]   ;;  %s3142_s10 = inlined_call_operand.vmem [shape: f32[1,128], index: 10, kind: input, shape index: {}]   ;;  %s3143_s11 = inlined_call_operand.hbm [shape: f32[128,128], index: 11, kind: input, shape index: {}]   ;;  %s3144_s12 = inlined_call_operand.vmem [shape: f32[1,128], index: 12, kind: input, shape index: {}]   ;;  %s3145_s13 = inlined_call_operand.vmem [shape: f32[1,128], index: 13, kind: input, shape index: {}]   ;;  %s3146_s14 = inlined_call_operand.vmem [shape: f32[1,128], index: 14, kind: input, shape index: {}]   ;;  %s3147_s15 = inlined_call_operand.hbm [shape: f32[12,128], index: 15, kind: output, shape index: {}]  }
   0x1   :  { %3153 = sst [smem:[#allocation21_spill]] %s3134_s2 }
   0x2   :  { %3154 = sst [smem:[#allocation22_spill]] %s3135_s3 }
   0x3   :  { %3155 = sst [smem:[#allocation23_spill]] %s3138_s6 }
   0x4   :  { %3156 = sst [smem:[#allocation24_spill]] %s3139_s7 }
   0x5   :  { %3157 = sst [smem:[#allocation25_spill]] %s3140_s8 }
   0x6   :  { %3158 = sst [smem:[#allocation26_spill]] %s3141_s9 }
   0x7   :  { %3159 = sst [smem:[#allocation27_spill]] %s3142_s10 }
   0x8   :  { %3160 = sst [smem:[#allocation28_spill]] %s3143_s11 }
   0x9   :  { %3161 = sst [smem:[#allocation29_spill]] %s3144_s12 }
   0xa   :  { %3162 = sst [smem:[#allocation30_spill]] %s3145_s13 }
   0xb   :  { %3163 = sst [smem:[#allocation31_spill]] %s3146_s14 }
   0xc   :  { %3164 = sst [smem:[#allocation32_spill]] %s3147_s15 }
   0xd   :  { %20 = vsyncpa [#allocation3], 0 }
   0xe   :  { %22 = vsyncpa [#allocation3 + $0x1], 0 }
   0xf   :  { %23 = vsyncpa [#allocation6], 0 }
  0x10   :  { %25 = vsyncpa [#allocation6 + $0x1], 0 }
  0x11   :  { %26 = vsyncpa [#allocation9], 0 }
  0x12   :  { %27 = vsyncpa [#allocation12], 0 }
  0x13   :  { %28 = vsyncpa [#allocation4], 0 }
  0x14   :  { %30 = vsyncpa [#allocation4 + $0x1], 0  ;;  %s2617_s18 = smov 0   ;;  %s2619_s19 = smov 0  }
  0x15   :  { %s2621_s20 = smov 0   ;;  %s2623_s21 = smov 0  }
  0x16 LB: > { %s2524_s22 = smov [#allocation7]   ;;  %s2638_s24 = sadd.s32 4294967295, %s2522_s21   ;;  %s2522_s21 = sphi %s2623_s21, %s3199_s21   ;;  %s2518_s20 = sphi %s2621_s20, %s3198_s20   ;;  %s2514_s19 = sphi %s2619_s19, %s3197_s19   ;;  %s2510_s18 = sphi %s2617_s18, %s3196_s18  }
  0x17   : > { %s404_s23 = sshll.u32 %s2524_s22, 4  ;;  %p1489_p0 = scmp.ge.s32.totalorder %s2522_s21, 1  ;;  %s2643_s23 = int_to_ptr.vmem [resolvable:$true] %s404_s23 }
  0x18   : > { %p3149_p1 = scmp.eq.s32.totalorder %s2638_s24, 0  ;;  %p392_p2 = scmp.lt.s32.totalorder %s2522_s21, 3 }
  0x19   : > { %s2525_s26 = smov [#allocation8]   ;;  %s2526_s29 = smov [#allocation11]  }
  0x1a   : > { %p2645_p3 = pnand %p1489_p0, %p392_p2  ;;  %s417_s27 = sshll.u32 %s2525_s26, 4  ;;  %s2658_s27 = int_to_ptr.vmem [resolvable:$true] %s417_s27 }
  0x1b   : > { %s455_s30 = sshll.u32 %s2526_s29, 4  ;;  %s3167_s2 = sld [smem:[#allocation21_spill]]  ;;  %s2660_s30 = int_to_ptr.vmem [resolvable:$true] %s455_s30 }
  0x1c   : > { %s3165_s25 = scalar_select %p2645_p3, 1, 0 }
  0x1d   : > { %p2155_p5 = pneg %p2645_p3 }
  0x1f   : > { %p2654_p6 = pnand %p2155_p5, %p3149_p1 }
  0x21   : > { %s2240_s22 = scalar_lea.hbm %s3167_s2, 2048  ;;  %p2670_p8 = pneg %p2654_p6 }
  0x22   : > { %p2241_p7 = scmp.ne.s32.totalorder %s3167_s2, %s2240_s22  ;;  %p2247_p11 = scmp.lt.u32.totalorder %s2240_s22, %s3167_s2 }
  0x24   : > { %p2243_p9 = pnand %p2670_p8, %p2241_p7 }
  0x26   : > { %p2244_p10 = pneg %p2243_p9 }
  0x28   : > { %p2249_p12 = pnand %p2247_p11, %p2244_p10 }
  0x2a   : > { %2252 = shalt.err (!%p2249_p12)
}
  0x2b   : > { %s2253_s14 = scalar_lea.vmem %s2643_s23, 2048  ;;  %p2261_p5 = scmp.lt.s32.totalorder %s2643_s23, %s2643_s23 }
  0x2c   : > { %p2254_p13 = scmp.ne.s32.totalorder %s2643_s23, %s2253_s14  ;;  %p2262_p4 = scmp.lt.s32.totalorder %s2253_s14, %s2253_s14 }
  0x2e   : > { %p2256_p0 = pnand %p2254_p13, %p2670_p8  ;;  %p2263_p7 = por %p2262_p4, %p2261_p5 }
  0x30   : > { %p2257_p2 = pneg %p2256_p0 }
  0x32   : > { %p2264_p9 = pnand %p2263_p7, %p2257_p2 }
  0x34   : > { %2267 = shalt.err (!%p2264_p9)
}
  0x35   : > { %s2527_s15 = smov 128   ;;  %s2528_s13 = smov 8  }
  0x36   : > { %2158 = dma.hbm_to_vmem [thread:$0]  (!%p2654_p6), %s3167_s2, 2048, %s2643_s23, [#allocation6], %s2527_s15, %s2527_s15, %s2528_s13  }
  0x37   : > { %s3169_s3 = sld [smem:[#allocation22_spill]] }
  0x3d   : > { %s2268_s14 = scalar_lea.hbm %s3169_s3, 2048 }
  0x3e   : > { %p2269_p4 = scmp.ne.s32.totalorder %s3169_s3, %s2268_s14  ;;  %p2275_p12 = scmp.lt.u32.totalorder %s2268_s14, %s3169_s3 }
  0x40   : > { %p2271_p10 = pnand %p2269_p4, %p2670_p8 }
  0x42   : > { %p2272_p11 = pneg %p2271_p10 }
  0x44   : > { %p2277_p13 = pnand %p2275_p12, %p2272_p11 }
  0x46   : > { %2280 = shalt.err (!%p2277_p13)
}
  0x47   : > { %s2281_s23 = scalar_lea.vmem %s2658_s27, 2048  ;;  %p2289_p7 = scmp.lt.s32.totalorder %s2658_s27, %s2658_s27 }
  0x48   : > { %p2282_p0 = scmp.ne.s32.totalorder %s2658_s27, %s2281_s23  ;;  %p2290_p9 = scmp.lt.s32.totalorder %s2281_s23, %s2281_s23 }
  0x4a   : > { %p2284_p2 = pnand %p2282_p0, %p2670_p8  ;;  %p2291_p4 = por %p2290_p9, %p2289_p7 }
  0x4c   : > { %p2285_p5 = pneg %p2284_p2 }
  0x4e   : > { %p2292_p10 = pnand %p2291_p4, %p2285_p5 }
  0x50   : > { %2295 = shalt.err (!%p2292_p10)
}
  0x51   : > { %2161 = dma.hbm_to_vmem [thread:$0]  (!%p2654_p6), %s3169_s3, 2048, %s2658_s27, [#allocation9], %s2527_s15, %s2527_s15, %s2528_s13  }
  0x52   : > { %s3170_s9 = sld [smem:[#allocation26_spill]] }
  0x58   : > { %s2296_s16 = scalar_lea.hbm %s3170_s9, 2048 }
  0x59   : > { %p2297_p11 = scmp.ne.s32.totalorder %s3170_s9, %s2296_s16  ;;  %p2303_p0 = scmp.lt.u32.totalorder %s2296_s16, %s3170_s9 }
  0x5b   : > { %p2299_p12 = pnand %p2297_p11, %p2670_p8 }
  0x5d   : > { %p2300_p13 = pneg %p2299_p12 }
  0x5f   : > { %p2305_p2 = pnand %p2303_p0, %p2300_p13 }
  0x61   : > { %2308 = shalt.err (!%p2305_p2)
}
  0x62   : > { %s2309_s27 = scalar_lea.vmem %s2660_s30, 2048  ;;  %p2317_p4 = scmp.lt.s32.totalorder %s2660_s30, %s2660_s30 }
  0x63   : > { %p2310_p5 = scmp.ne.s32.totalorder %s2660_s30, %s2309_s27  ;;  %p2318_p10 = scmp.lt.s32.totalorder %s2309_s27, %s2309_s27 }
  0x65   : > { %p2312_p7 = pnand %p2310_p5, %p2670_p8  ;;  %p2319_p11 = por %p2318_p10, %p2317_p4 }
  0x67   : > { %p2313_p9 = pneg %p2312_p7 }
  0x69   : > { %p2320_p12 = pnand %p2319_p11, %p2313_p9 }
  0x6b   : > { %2323 = shalt.err (!%p2320_p12)
}
  0x6c   : > { %2167 = dma.hbm_to_vmem [thread:$0]  (!%p2654_p6), %s3170_s9, 2048, %s2660_s30, [#allocation12], %s2527_s15, %s2527_s15, %s2528_s13  }
  0x6d   : > { %s2529_s8 = smov [#allocation10]   ;;  %s2530_s12 = smov [#allocation13]  }
  0x6e   : > { %s439_s10 = sshll.u32 %s2529_s8, 4  ;;  %s471_s16 = sshll.u32 %s2530_s12, 4  ;;  %s440_s10 = int_to_ptr.vmem [resolvable:$true] %s439_s10  ;;  %s472_s16 = int_to_ptr.vmem [resolvable:$true] %s471_s16 }
  0x6f   : > { %s3171_s7 = sld [smem:[#allocation24_spill]] }
  0x75   : > { %s2324_s29 = scalar_lea.hbm %s3171_s7, 2048 }
  0x76   : > { %p2325_p13 = scmp.ne.s32.totalorder %s3171_s7, %s2324_s29  ;;  %p2331_p5 = scmp.lt.u32.totalorder %s2324_s29, %s3171_s7 }
  0x78   : > { %p2327_p0 = pnand %p2325_p13, %p2670_p8 }
  0x7a   : > { %p2328_p2 = pneg %p2327_p0 }
  0x7c   : > { %p2333_p7 = pnand %p2331_p5, %p2328_p2 }
  0x7e   : > { %2336 = shalt.err (!%p2333_p7)
}
  0x7f   : > { %s2337_s30 = scalar_lea.vmem %s440_s10, 2048  ;;  %p2345_p11 = scmp.lt.s32.totalorder %s440_s10, %s440_s10 }
  0x80   : > { %p2338_p9 = scmp.ne.s32.totalorder %s440_s10, %s2337_s30  ;;  %p2346_p12 = scmp.lt.s32.totalorder %s2337_s30, %s2337_s30 }
  0x82   : > { %p2340_p4 = pnand %p2338_p9, %p2670_p8  ;;  %p2347_p1 = por %p2346_p12, %p2345_p11 }
  0x84   : > { %p2341_p10 = pneg %p2340_p4 }
  0x86   : > { %p2348_p3 = pnand %p2347_p1, %p2341_p10 }
  0x88   : > { %2351 = shalt.err (!%p2348_p3)
}
  0x89   : > { %2164 = dma.hbm_to_vmem [thread:$0]  (!%p2654_p6), %s3171_s7, 2048, %s440_s10, [#allocation9], %s2527_s15, %s2527_s15, %s2528_s13  }
  0x8a   : > { %s3172_s11 = sld [smem:[#allocation28_spill]] }
  0x90   : > { %s2352_s17 = scalar_lea.hbm %s3172_s11, 2048 }
  0x91   : > { %p2353_p1 = scmp.ne.s32.totalorder %s3172_s11, %s2352_s17  ;;  %p2359_p0 = scmp.lt.u32.totalorder %s2352_s17, %s3172_s11 }
  0x93   : > { %p2355_p3 = pnand %p2353_p1, %p2670_p8 }
  0x95   : > { %p2356_p13 = pneg %p2355_p3 }
  0x97   : > { %p2361_p2 = pnand %p2359_p0, %p2356_p13 }
  0x99   : > { %2364 = shalt.err (!%p2361_p2)
}
  0x9a   : > { %s2365_s23 = scalar_lea.vmem %s472_s16, 2048  ;;  %p2373_p4 = scmp.lt.s32.totalorder %s472_s16, %s472_s16 }
  0x9b   : > { %p2366_p5 = scmp.ne.s32.totalorder %s472_s16, %s2365_s23  ;;  %p2374_p10 = scmp.lt.s32.totalorder %s2365_s23, %s2365_s23 }
  0x9d   : > { %p2368_p7 = pnand %p2366_p5, %p2670_p8  ;;  %p2375_p11 = por %p2374_p10, %p2373_p4 }
  0x9f   : > { %p2369_p9 = pneg %p2368_p7 }
  0xa1   : > { %p2376_p12 = pnand %p2375_p11, %p2369_p9 }
  0xa3   : > { %2379 = shalt.err (!%p2376_p12)
}
  0xa4   : > { %2170 = dma.hbm_to_vmem [thread:$0]  (!%p2654_p6), %s3172_s11, 2048, %s472_s16, [#allocation12], %s2527_s15, %s2527_s15, %s2528_s13  }
  0xa5   : > { %s1488_s28 = sadd.s32 4294967294, %s2522_s21   ;;  %s2790_s26 = sadd.s32 1, %s2522_s21  }
  0xa6   : > { %s43_s2 = sadd.s32 1, %s2518_s20  ;;  %s40_s6 = ssub.s32 %s2522_s21, %s2790_s26 }
  0xa7   : > { %p50_p8 = scmp.ne.s32.totalorder %s2518_s20, %s2514_s19  ;;  %p41_p1 = scmp.eq.s32.totalorder %s40_s6, 0 }
  0xa8   : > { %p51_p3 = scmp.eq.s32.totalorder %s2522_s21, 0  ;;  %p56_p13 = scmp.ne.s32.totalorder %s2514_s19, %s2510_s18 }
  0xa9   : > { %p379_p0 = scmp.eq.s32.totalorder %s2638_s24, 1  ;;  %p3173_p5 = scmp.eq.s32.totalorder %s2638_s24, 0 }
  0xaa   : > { %s2802_s8 = scalar_select %p41_p1, %s2518_s20, %s43_s2  }
  0xab   : > { %p52_p2 = por %p51_p3, %p50_p8  ;;  %p2806_p7 = por %p3173_p5, %p56_p13 }
  0xac   : > { %p2810_p6 = por %p379_p0, %p50_p8  ;;  %p385_p9 = scmp.eq.s32.totalorder %s1488_s28, 1 }
  0xad   : > { %s3174_s12 = scalar_select %p2806_p7, 1, 0 }
  0xae   : > { %s3175_s15 = scalar_select %p2810_p6, 1, 0 }
  0xaf   : > { %p2187_p4 = scmp.lt.s32.totalorder %s2522_s21, 2  ;;  %s494_s13 = sand.u32 1, %s2518_s20  }
  0xb0   : > { %p2816_p10 = por %p385_p9, %p56_p13  ;;  %s2820_s17 = sshll.u32 %s494_s13, 3 }
  0xb1   : > { %s1497_s22 = sshll.u32 %s2522_s21, 7  ;;  %s498_s23 = scalar_lea.vmem [#allocation2], %s2820_s17 }
  0xb2   : > { %s3176_s16 = scalar_select %p2816_p10, 1, 0 }
  0xb3   : > { %s2826_s27 = scalar_lea.hbm %s3132_s0, %s1497_s22  ;;  %s505_s10 = sshll.u32 %s498_s23, 4  ;;  %s2833_s10 = int_to_ptr.vmem [resolvable:$true] %s505_s10 }
  0xb4   : > { %p2829_p11 = pnand %p2187_p4, %p52_p2  ;;  %s2838_s6 = scalar_lea.hbm %s3133_s1, %s1497_s22 }
  0xb5   : > { %s495_s29 = scalar_lea.sflag [#allocation3], %s494_s13  ;;  %s2380_s14 = scalar_lea.hbm %s2826_s27, 128 }
  0xb6   : > { %p2381_p12 = scmp.ne.s32.totalorder %s2826_s27, %s2380_s14  ;;  %p2382_p8 = pneg %p2829_p11 }
  0xb7   : > { %s2385_s7 = scalar_lea.hbm %s3132_s0, 256  ;;  %p2386_p13 = scmp.lt.u32.totalorder %s2826_s27, %s3132_s0 }
  0xb8   : > { %p2383_p1 = pnand %p2382_p8, %p2381_p12  ;;  %p2387_p0 = scmp.lt.u32.totalorder %s2385_s7, %s2380_s14 }
  0xb9   : > { %p2389_p5 = scmp.lt.u32.totalorder %s2380_s14, %s2826_s27 }
  0xba   : > { %p2384_p3 = pneg %p2383_p1  ;;  %p2388_p2 = por %p2387_p0, %p2386_p13 }
  0xbc   : > { %p2390_p9 = por %p2389_p5, %p2388_p2 }
  0xbe   : > { %p2391_p4 = pnand %p2390_p9, %p2384_p3 }
  0xc0   : > { %2394 = shalt.err (!%p2391_p4)
}
  0xc1   : > { %s2395_s13 = scalar_lea.vmem %s2833_s10, 128  ;;  %s2531_s3 = smov [#allocation2]  }
  0xc2   : > { %p2396_p12 = scmp.ne.s32.totalorder %s2833_s10, %s2395_s13  ;;  %s2400_s22 = sshll.u32 %s2531_s3, 4  ;;  %s2401_s22 = int_to_ptr.vmem [resolvable:$false] %s2400_s22 }
  0xc3   : > { %s2402_s9 = scalar_lea.vmem %s2401_s22, 256  ;;  %p2403_p6 = scmp.lt.s32.totalorder %s2833_s10, %s2401_s22 }
  0xc4   : > { %p2398_p1 = pnand %p2396_p12, %p2382_p8  ;;  %p2404_p13 = scmp.lt.s32.totalorder %s2402_s9, %s2395_s13 }
  0xc6   : > { %p2399_p10 = pneg %p2398_p1  ;;  %p2405_p0 = por %p2404_p13, %p2403_p6 }
  0xc8   : > { %p2406_p2 = pnand %p2405_p0, %p2399_p10 }
  0xca   : > { %2409 = shalt.err (!%p2406_p2)
}
  0xcb   : > { %2174 = dma.hbm_to_vmem [thread:$0]  (!%p2829_p11), %s2826_s27, 128, %s2833_s10, %s495_s29  }
  0xcc   : > { %s512_s7 = sand.u32 1, %s2522_s21   ;;  %s516_s11 = scalar_lea.vmem [#allocation5], %s2820_s17 }
  0xcd   : > { %s523_s28 = sshll.u32 %s516_s11, 4  ;;  %s513_s2 = scalar_lea.sflag [#allocation6], %s512_s7  ;;  %s524_s28 = int_to_ptr.vmem [resolvable:$true] %s523_s28 }
  0xce   : > { %s2410_s14 = scalar_lea.hbm %s2838_s6, 128  ;;  %s2415_s3 = scalar_lea.hbm %s3133_s1, 256 }
  0xcf   : > { %p2411_p6 = scmp.ne.s32.totalorder %s2838_s6, %s2410_s14  ;;  %p2416_p5 = scmp.lt.u32.totalorder %s2838_s6, %s3133_s1 }
  0xd0   : > { %p2417_p9 = scmp.lt.u32.totalorder %s2415_s3, %s2410_s14  ;;  %p2419_p12 = scmp.lt.u32.totalorder %s2410_s14, %s2838_s6 }
  0xd1   : > { %p2413_p10 = pnand %p2411_p6, %p2382_p8 }
  0xd2   : > { %p2418_p4 = por %p2417_p9, %p2416_p5 }
  0xd3   : > { %p2414_p3 = pneg %p2413_p10 }
  0xd4   : > { %p2420_p1 = por %p2419_p12, %p2418_p4 }
  0xd6   : > { %p2421_p13 = pnand %p2420_p1, %p2414_p3 }
  0xd8   : > { %2424 = shalt.err (!%p2421_p13)
}
  0xd9   : > { %s2425_s17 = scalar_lea.vmem %s524_s28, 128  ;;  %s2532_s27 = smov [#allocation5]  }
  0xda   : > { %p2426_p0 = scmp.ne.s32.totalorder %s524_s28, %s2425_s17  ;;  %s2430_s10 = sshll.u32 %s2532_s27, 4  ;;  %s2431_s10 = int_to_ptr.vmem [resolvable:$false] %s2430_s10 }
  0xdb   : > { %s2432_s29 = scalar_lea.vmem %s2431_s10, 256  ;;  %p2433_p10 = scmp.lt.s32.totalorder %s524_s28, %s2431_s10 }
  0xdc   : > { %p2428_p2 = pnand %p2426_p0, %p2382_p8  ;;  %p2434_p7 = scmp.lt.s32.totalorder %s2432_s29, %s2425_s17 }
  0xde   : > { %p2429_p6 = pneg %p2428_p2  ;;  %p2435_p5 = por %p2434_p7, %p2433_p10 }
  0xe0   : > { %p2436_p9 = pnand %p2435_p5, %p2429_p6 }
  0xe2   : > { %2439 = shalt.err (!%p2436_p9)
}
  0xe3   : > { %2177 = dma.hbm_to_vmem [thread:$0]  (!%p2829_p11), %s2838_s6, 128, %s524_s28, %s513_s2  }
  0xe4   : > { %p3178_p3 = scmp.ne.s32.totalorder %s3165_s25, 0 }
  0xe5   : > { %s2889_s7 = sand.u32 (!%p3178_p3), 1, %s2514_s19   ;;  %p3179_p7 = scmp.ne.s32.totalorder (!%p3178_p3), %s3174_s12, 0 }
  0xe6   : > { %532 = sbr.rel (%p3178_p3) target bundleno = 2057 (0x809), region = 80  ;;  %s2892_s11 = sshll.u32 (!%p3178_p3), %s2889_s7, 3 }
  0xe7   : > { %s535_s14 = scalar_lea.sflag (!%p3178_p3), [#allocation3], %s2889_s7  ;;  %s538_s23 = scalar_lea.vmem (!%p3178_p3), [#allocation2], %s2892_s11 }
  0xed   : > { %2485 = dma.done.wait (%p3179_p7), %s535_s14, 128  }
  0xee   : > { %2487 = vsyncadd (%p3179_p7), %s535_s14, 4294967168  ;;  %s543_s25 = sand.u32 1, %s2638_s24   ;;  %s547_s6 = scalar_lea.vmem [#allocation5], %s2892_s11 }
  0xef   : > { %s544_s30 = scalar_lea.sflag [#allocation6], %s543_s25 }
  0xf0   : > { %2489 = dma.done.wait (%p3179_p7), %s544_s30, 128  }
  0xf1   : > { %2491 = vsyncadd (%p3179_p7), %s544_s30, 4294967168  ;;  %p3180_p11 = scmp.eq.s32.totalorder %s2638_s24, 0 }
  0xf3   : > { %2493 = dma.done.wait (%p3180_p11), [#allocation6], 2048   ;;  %p3181_p8 = pmov %p3180_p11 }
  0xf5   : > { %2495 = vsyncadd (%p3181_p8), [#allocation6], 4294965248  ;;  %p3182_p4 = pmov %p3181_p8 }
  0xf7   : > { %2497 = dma.done.wait (%p3182_p4), [#allocation9], 4096   ;;  %p3183_p12 = pmov %p3182_p4 }
  0xf8   : > { %p3184_p1 = pmov %p3182_p4 }
  0xf9   : > { %2499 = vsyncadd (%p3183_p12), [#allocation9], 4294963200 }
  0xfa   : > { %2501 = dma.done.wait (%p3184_p1), [#allocation12], 4096   ;;  %p3185_p13 = pmov %p3184_p1 }
  0xfb   : > { %v2533_v0 = vmov 0.0|0.0   ;;  %vm2534_vm0 = vmmov 0   ;;  %v2535_v1 = vmov 0.0   ;;  %v621_v2 = vld [vmem:[#allocation8] sm:$0xff]  ;;  %v622_v3 = vld [vmem:[#allocation8 + $0x8] sm:$0xff]  ;;  %v623_v4 = vld [vmem:[#allocation8 + $0x10] sm:$0xff] }
  0xfc   : > { %2503 = vsyncadd (%p3185_p13), [#allocation12], 4294963200  ;;  %1937 = vmatprep.subr.bf16.mxu0 %v2533_v0  ;;  %1689 = vmatprep.mubr.msk.f32.mxu0 %vm2534_vm0, %v2535_v1  ;;  %v1938_v5 = vpack.c.bf16 %v622_v3, %v621_v2  ;;  %v624_v6 = vld [vmem:[#allocation8 + $0x18] sm:$0xff]  ;;  %v625_v8 = vld [vmem:[#allocation8 + $0x20] sm:$0xff]  ;;  %s3186_s9 = sld [smem:[#allocation23_spill]]  ;;  %s3187_s10 = sld [smem:[#allocation25_spill]] }
  0xfd   : > { %1961 = vmatprep.subr.bf16.mxu1 %v2533_v0  ;;  %1724 = vmatprep.mubr.msk.f32.mxu1 %vm2534_vm0, %v2535_v1  ;;  %v1941_v7 = vpack.c.bf16 %v624_v6, %v623_v4  ;;  %v626_v9 = vld [vmem:[#allocation8 + $0x28] sm:$0xff]  ;;  %v770_v10 = vld [vmem:[#allocation7] sm:$0xff]  ;;  %v772_v12 = vld [vmem:[#allocation7 + $0x10] sm:$0xff]  ;;  %s3190_s2 = sld [smem:[#allocation30_spill]]  ;;  %s3191_s22 = sld [smem:[#allocation31_spill]] }
  0xfe   : > { %1939 = vmatpush3.bf16.msra.mxu0 %v1938_v5  ;;  %v771_v11 = vld [vmem:[#allocation7 + $0x8] sm:$0xff]  ;;  %v773_v13 = vld [vmem:[#allocation7 + $0x18] sm:$0xff]  ;;  %v1944_v14 = vpack.c.bf16 %v626_v9, %v625_v8  ;;  %v627_v16 = vld [vmem:[#allocation8 + $0x30] sm:$0xff]  ;;  %s618_s17 = scalar_lea.vmem [#allocation14], %s2892_s11  ;;  %s3192_s14 = sld [smem:[#allocation32_spill]] }
  0xff   : > { %1940 = vmatprep.subr.bf16.mxu0 %v2533_v0  ;;  %v2925_v15 = vpack.c.bf16 %v771_v11, %v770_v10  ;;  %v628_v17 = vld [vmem:[#allocation8 + $0x38] sm:$0xff]  ;;  %v2929_v18 = vpack.c.bf16 %v773_v13, %v772_v12  ;;  %v774_v19 = vld [vmem:[#allocation7 + $0x20] sm:$0xff]  ;;  %v775_v20 = vld [vmem:[#allocation7 + $0x28] sm:$0xff]  ;;  %s1348_s27 = sshll.u32 %s618_s17, 4  ;;  %s1335_s25 = scalar_lea.sflag [#allocation4], %s2889_s7  ;;  %s3090_s27 = int_to_ptr.vmem [resolvable:$true] %s1348_s27 }
 0x100   : > { %v1947_v21 = vpack.c.bf16 %v628_v17, %v627_v16  ;;  %v629_v22 = vld [vmem:[#allocation8 + $0x40] sm:$0xff]  ;;  %v630_v23 = vld [vmem:[#allocation8 + $0x48] sm:$0xff]  ;;  %v2934_v24 = vpack.c.bf16 %v775_v20, %v774_v19  ;;  %v776_v25 = vld [vmem:[#allocation7 + $0x30] sm:$0xff]  ;;  %s2440_s30 = scalar_lea.vmem %s3090_s27, 128  ;;  %p3193_p2 = scmp.ne.s32.totalorder %s3175_s15, 0 }
 0x101   : > { %1963 = vmatpush3.bf16.msra.mxu1 %v2925_v15  ;;  %v777_v26 = vld [vmem:[#allocation7 + $0x38] sm:$0xff]  ;;  %v1950_v27 = vpack.c.bf16 %v630_v23, %v629_v22  ;;  %v631_v28 = vld [vmem:[#allocation8 + $0x50] sm:$0xff]  ;;  %v778_v31 = vld [vmem:[#allocation7 + $0x40] sm:$0xff]  ;;  %p2441_p0 = scmp.ne.s32.totalorder %s3090_s27, %s2440_s30 }
 0x102   : > { %1942 = vmatpush3.bf16.msra.mxu0 %v1941_v7  ;;  %1964 = vmatprep.subr.bf16.mxu1 %v2533_v0  ;;  %v632_v29 = vld [vmem:[#allocation8 + $0x58] sm:$0xff]  ;;  %v2939_v30 = vpack.c.bf16 %v777_v26, %v776_v25  ;;  %v779_v32 = vld [vmem:[#allocation7 + $0x48] sm:$0xff]  ;;  %v633_v34 = vld [vmem:[#allocation8 + $0x60] sm:$0xff] }
 0x103   : > { %1943 = vmatprep.subr.bf16.mxu0 %v2533_v0  ;;  %v1953_v33 = vpack.c.bf16 %v632_v29, %v631_v28  ;;  %v634_v35 = vld [vmem:[#allocation8 + $0x68] sm:$0xff]  ;;  %v2944_v36 = vpack.c.bf16 %v779_v32, %v778_v31  ;;  %v780_v37 = vld [vmem:[#allocation7 + $0x50] sm:$0xff]  ;;  %v781_v38 = vld [vmem:[#allocation7 + $0x58] sm:$0xff]  ;;  %p2442_p6 = pnand %p2441_p0, %p3193_p2 }
 0x104   : > { %v1956_v39 = vpack.c.bf16 %v634_v35, %v633_v34  ;;  %v635_v40 = vld [vmem:[#allocation8 + $0x70] sm:$0xff]  ;;  %v636_v41 = vld [vmem:[#allocation8 + $0x78] sm:$0xff]  ;;  %v2949_v42 = vpack.c.bf16 %v781_v38, %v780_v37  ;;  %v782_v43 = vld [vmem:[#allocation7 + $0x60] sm:$0xff] }
 0x105   : > { %1966 = vmatpush3.bf16.msra.mxu1 %v2929_v18  ;;  %v783_v44 = vld [vmem:[#allocation7 + $0x68] sm:$0xff]  ;;  %v1959_v45 = vpack.c.bf16 %v636_v41, %v635_v40  ;;  %v620_v47 = vld [vmem:[%s547_s6] sm:$0xff]  ;;  %v1509_v51 = vld [vmem:[%s3136_s4] ss:$0 sm:$0xff]  ;;  %s3189_s6 = sld [smem:[#allocation29_spill]]  ;;  %p2443_p10 = pneg %p2442_p6 }
 0x106   : > { %1945 = vmatpush3.bf16.msra.mxu0 %v1944_v14  ;;  %1967 = vmatprep.subr.bf16.mxu1 %v2533_v0  ;;  %v2954_v46 = vpack.c.bf16 %v783_v44, %v782_v43  ;;  %v784_v48 = vld [vmem:[#allocation7 + $0x70] sm:$0xff]  ;;  %v785_v49 = vld [vmem:[#allocation7 + $0x78] sm:$0xff]  ;;  %v619_v52 = vld [vmem:[%s538_s23] sm:$0xff]  ;;  %s3188_s23 = sld [smem:[#allocation27_spill]] }
 0x107   : > { %1946 = vmatprep.subr.bf16.mxu0 %v2533_v0  ;;  %v2978_v50 = vpack.c.bf16 %v785_v49, %v784_v48  ;;  %v640_v57 = vld [vmem:[#allocation10] sm:$0xff]  ;;  %v641_v58 = vld [vmem:[#allocation10 + $0x8] sm:$0xff]  ;;  %v642_v59 = vld [vmem:[#allocation10 + $0x10] sm:$0xff] }
 0x108   : > { %v2010_v60 = vpack.c.bf16 %v641_v58, %v640_v57  ;;  %v643_v61 = vld [vmem:[#allocation10 + $0x18] sm:$0xff]  ;;  %v644_v63 = vld [vmem:[#allocation10 + $0x20] sm:$0xff]  ;;  %v645_v2 = vld [vmem:[#allocation10 + $0x28] sm:$0xff] }
 0x109   : > { %1969 = vmatpush3.bf16.msra.mxu1 %v2934_v24  ;;  %v2013_v62 = vpack.c.bf16 %v643_v61, %v642_v59  ;;  %v2016_v3 = vpack.c.bf16 %v645_v2, %v644_v63  ;;  %v646_v8 = vld [vmem:[#allocation10 + $0x30] sm:$0xff]  ;;  %v647_v9 = vld [vmem:[#allocation10 + $0x38] sm:$0xff]  ;;  %v648_v11 = vld [vmem:[#allocation10 + $0x40] sm:$0xff] }
 0x10a   : > { %1948 = vmatpush3.bf16.msra.mxu0 %v1947_v21  ;;  %1970 = vmatprep.subr.bf16.mxu1 %v2533_v0  ;;  %v2019_v10 = vpack.c.bf16 %v647_v9, %v646_v8  ;;  %v649_v12 = vld [vmem:[#allocation10 + $0x48] sm:$0xff]  ;;  %v650_v14 = vld [vmem:[#allocation10 + $0x50] sm:$0xff]  ;;  %v651_v16 = vld [vmem:[#allocation10 + $0x58] sm:$0xff] }
 0x10b   : > { %1949 = vmatprep.subr.bf16.mxu0 %v2533_v0  ;;  %v2022_v13 = vpack.c.bf16 %v649_v12, %v648_v11  ;;  %v2025_v17 = vpack.c.bf16 %v651_v16, %v650_v14  ;;  %v652_v19 = vld [vmem:[#allocation10 + $0x60] sm:$0xff]  ;;  %v653_v20 = vld [vmem:[#allocation10 + $0x68] sm:$0xff]  ;;  %v654_v22 = vld [vmem:[#allocation10 + $0x70] sm:$0xff] }
 0x10c   : > { %v2028_v21 = vpack.c.bf16 %v653_v20, %v652_v19  ;;  %v655_v23 = vld [vmem:[#allocation10 + $0x78] sm:$0xff]  ;;  %v657_v26 = vld [vmem:[#allocation11] sm:$0xff]  ;;  %v659_v28 = vld [vmem:[#allocation11 + $0x10] sm:$0xff] }
 0x10d   : > { %1972 = vmatpush3.bf16.msra.mxu1 %v2939_v30  ;;  %v2031_v25 = vpack.c.bf16 %v655_v23, %v654_v22  ;;  %v660_v31 = vld [vmem:[#allocation11 + $0x18] sm:$0xff]  ;;  %v662_v34 = vld [vmem:[#allocation11 + $0x28] sm:$0xff]  ;;  %v663_v37 = vld [vmem:[#allocation11 + $0x30] sm:$0xff] }
 0x10e   : > { %1951 = vmatpush3.bf16.msra.mxu0 %v1950_v27  ;;  %1973 = vmatprep.subr.bf16.mxu1 %v2533_v0  ;;  %v658_v27 = vld [vmem:[#allocation11 + $0x8] sm:$0xff]  ;;  %v2037_v32 = vpack.c.bf16 %v660_v31, %v659_v28  ;;  %v664_v38 = vld [vmem:[#allocation11 + $0x38] sm:$0xff]  ;;  %v665_v40 = vld [vmem:[#allocation11 + $0x40] sm:$0xff] }
 0x10f   : > { %1952 = vmatprep.subr.bf16.mxu0 %v2533_v0  ;;  %v2034_v29 = vpack.c.bf16 %v658_v27, %v657_v26  ;;  %v666_v41 = vld [vmem:[#allocation11 + $0x48] sm:$0xff]  ;;  %v667_v44 = vld [vmem:[#allocation11 + $0x50] sm:$0xff]  ;;  %v669_v48 = vld [vmem:[#allocation11 + $0x60] sm:$0xff] }
 0x110   : > { %v2046_v43 = vpack.c.bf16 %v666_v41, %v665_v40  ;;  %v670_v49 = vld [vmem:[#allocation11 + $0x68] sm:$0xff]  ;;  %v1511_v58 = vld [vmem:[%s3186_s9] ss:$0 sm:$0xff]  ;;  %v671_v61 = vld [vmem:[#allocation11 + $0x70] sm:$0xff]  ;;  %s1518_s9 = sshll.u32 %s2638_s24, 7  ;;  %s2536_s24 = smov [#allocation14]  }
 0x111   : > { %1975 = vmatpush3.bf16.msra.mxu1 %v2944_v36  ;;  %v674_v2 = vld [vmem:[#allocation13] sm:$0xff]  ;;  %v679_v9 = vld [vmem:[#allocation13 + $0x28] sm:$0xff]  ;;  %v680_v11 = vld [vmem:[#allocation13 + $0x30] sm:$0xff]  ;;  %s2444_s11 = sshll.u32 %s2536_s24, 4  ;;  %s2445_s11 = int_to_ptr.vmem [resolvable:$false] %s2444_s11 }
 0x112   : > { %1954 = vmatpush3.bf16.msra.mxu0 %v1953_v33  ;;  %1976 = vmatprep.subr.bf16.mxu1 %v2533_v0  ;;  %v661_v33 = vld [vmem:[#allocation11 + $0x20] sm:$0xff]  ;;  %v681_v12 = vld [vmem:[#allocation13 + $0x38] sm:$0xff]  ;;  %v683_v16 = vld [vmem:[#allocation13 + $0x48] sm:$0xff]  ;;  %p2447_p5 = scmp.lt.s32.totalorder %s3090_s27, %s2445_s11 }
 0x113   : > { %1955 = vmatprep.subr.bf16.mxu0 %v2533_v0  ;;  %v2040_v35 = vpack.c.bf16 %v662_v34, %v661_v33  ;;  %v678_v8 = vld [vmem:[#allocation13 + $0x20] sm:$0xff]  ;;  %v684_v19 = vld [vmem:[#allocation13 + $0x50] sm:$0xff]  ;;  %v685_v20 = vld [vmem:[#allocation13 + $0x58] sm:$0xff] }
 0x114   : > { %v682_v14 = vld [vmem:[#allocation13 + $0x40] sm:$0xff]  ;;  %v687_v23 = vld [vmem:[#allocation13 + $0x68] sm:$0xff]  ;;  %v689_v33 = vld [vmem:[#allocation13 + $0x78] sm:$0xff] }
 0x115   : > { %1978 = vmatpush3.bf16.msra.mxu1 %v2949_v42  ;;  %v686_v22 = vld [vmem:[#allocation13 + $0x60] sm:$0xff] }
 0x116   : > { %1957 = vmatpush3.bf16.msra.mxu0 %v1956_v39  ;;  %1979 = vmatprep.subr.bf16.mxu1 %v2533_v0  ;;  %v2043_v39 = vpack.c.bf16 %v664_v38, %v663_v37  ;;  %v1512_v26 = vld [vmem:[%s3187_s10] ss:$0 sm:$0xff] }
 0x117   : > { %1958 = vmatprep.subr.bf16.mxu0 %v2533_v0 }
 0x119   : > { %1981 = vmatpush3.bf16.msra.mxu1 %v2954_v46 }
 0x11a   : > { %1960 = vmatpush3.bf16.msra.mxu0 %v1959_v45  ;;  %1982 = vmatprep.subr.bf16.mxu1 %v2533_v0  ;;  %v668_v45 = vld [vmem:[#allocation11 + $0x58] sm:$0xff] }
 0x11b   : > { %1985 = vmatprep.subr.bf16.mxu0 %v2533_v0 }
 0x11d   : > { %1690 = vmatmul.mubr.f32.vlgmr.msra.gmra.mrb[0].mxu0 %v620_v47  ;;  %1984 = vmatpush3.bf16.msra.mxu1 %v2978_v50  ;;  %v2049_v47 = vpack.c.bf16 %v668_v45, %v667_v44  ;;  %v1515_v45 = vld [vmem:[%s3190_s2] ss:$0 sm:$0xff] }
 0x11e   : > { %1987 = vmatpush3.bf16.msra.mxu0 %v2925_v15  ;;  %1759 = vmatprep.mubr.msk.f32.mxu0 %vm2534_vm0, %v2535_v1 }
 0x11f   : > { %1988 = vmatprep.subr.bf16.mxu0 %v2533_v0  ;;  %2009 = vmatprep.subr.bf16.mxu1 %v2533_v0 }
 0x122   : > { %1990 = vmatpush3.bf16.msra.mxu0 %v2929_v18 }
 0x123   : > { %1991 = vmatprep.subr.bf16.mxu0 %v2533_v0 }
 0x126   : > { %1993 = vmatpush3.bf16.msra.mxu0 %v2934_v24 }
 0x127   : > { %1994 = vmatprep.subr.bf16.mxu0 %v2533_v0 }
 0x12a   : > { %1996 = vmatpush3.bf16.msra.mxu0 %v2939_v30 }
 0x12b   : > { %1997 = vmatprep.subr.bf16.mxu0 %v2533_v0 }
 0x12e   : > { %1999 = vmatpush3.bf16.msra.mxu0 %v2944_v36 }
 0x12f   : > { %2000 = vmatprep.subr.bf16.mxu0 %v2533_v0 }
 0x132   : > { %2002 = vmatpush3.bf16.msra.mxu0 %v2949_v42 }
 0x133   : > { %2003 = vmatprep.subr.bf16.mxu0 %v2533_v0 }
 0x136   : > { %2005 = vmatpush3.bf16.msra.mxu0 %v2954_v46 }
 0x137   : > { %2006 = vmatprep.subr.bf16.mxu0 %v2533_v0 }
 0x13a   : > { %2008 = vmatpush3.bf16.msra.mxu0 %v2978_v50 }
 0x13b   : > { %2033 = vmatprep.subr.bf16.mxu0 %v2533_v0 }
 0x1f0   : > { %v765_v53 = vpop.f32.mrb[0].mxu0 }
 0x1f1   : > { %v766_v54 = vadd.f32 %v1509_v51, %v765_v53  ;;  %v1691_v55 = vpop.f32.mrb[1].mxu0  ;;  %v2052_v51 = vpack.c.bf16 %v670_v49, %v669_v48  ;;  %v1516_v48 = vld [vmem:[%s3191_s22] ss:$0 sm:$0xff] }
 0x1f3   : > { %v769_v56 = vadd.f32 %v766_v54, %v619_v52 }
 0x1f5   : > { %1725 = vmatmul.mubr.f32.vlgmr.msra.gmra.mrb[0].mxu1 %v769_v56 }
 0x1f6   : > { %1794 = vmatprep.mubr.msk.f32.mxu1 %vm2534_vm0, %v2535_v1  ;;  %2011 = vmatpush3.bf16.msra.mxu1 %v2010_v60 }
 0x1f7   : > { %2012 = vmatprep.subr.bf16.mxu1 %v2533_v0 }
 0x1fa   : > { %2014 = vmatpush3.bf16.msra.mxu1 %v2013_v62  ;;  %v672_v62 = vld [vmem:[#allocation11 + $0x78] sm:$0xff] }
 0x1fb   : > { %2015 = vmatprep.subr.bf16.mxu1 %v2533_v0  ;;  %v2055_v63 = vpack.c.bf16 %v672_v62, %v671_v61 }
 0x1fe   : > { %2017 = vmatpush3.bf16.msra.mxu1 %v2016_v3  ;;  %v675_v3 = vld [vmem:[#allocation13 + $0x8] sm:$0xff] }
 0x1ff   : > { %2018 = vmatprep.subr.bf16.mxu1 %v2533_v0 }
 0x202   : > { %2020 = vmatpush3.bf16.msra.mxu1 %v2019_v10  ;;  %v2064_v10 = vpack.c.bf16 %v679_v9, %v678_v8 }
 0x203   : > { %2021 = vmatprep.subr.bf16.mxu1 %v2533_v0 }
 0x206   : > { %2023 = vmatpush3.bf16.msra.mxu1 %v2022_v13  ;;  %v2067_v13 = vpack.c.bf16 %v681_v12, %v680_v11 }
 0x207   : > { %2024 = vmatprep.subr.bf16.mxu1 %v2533_v0 }
 0x20a   : > { %2026 = vmatpush3.bf16.msra.mxu1 %v2025_v17  ;;  %v2070_v17 = vpack.c.bf16 %v683_v16, %v682_v14 }
 0x20b   : > { %2027 = vmatprep.subr.bf16.mxu1 %v2533_v0 }
 0x20e   : > { %2029 = vmatpush3.bf16.msra.mxu1 %v2028_v21  ;;  %v2073_v21 = vpack.c.bf16 %v685_v20, %v684_v19 }
 0x20f   : > { %2030 = vmatprep.subr.bf16.mxu1 %v2533_v0 }
 0x212   : > { %2032 = vmatpush3.bf16.msra.mxu1 %v2031_v25  ;;  %v2076_v25 = vpack.c.bf16 %v687_v23, %v686_v22 }
 0x213   : > { %2057 = vmatprep.subr.bf16.mxu1 %v2533_v0 }
 0x2c8   : > { %v852_v4 = vpop.f32.mrb[0].mxu1 }
 0x2c9   : > { %v2994_v5 = vsub.f32 %v769_v56, %v852_v4  ;;  %v1726_v6 = vpop.f32.mrb[1].mxu1  ;;  %v1510_v56 = vld [vmem:[%s3137_s5] ss:$0 sm:$0xff]  ;;  %v676_v4 = vld [vmem:[#allocation13 + $0x10] sm:$0xff] }
 0x2ca   : > { %v677_v6 = vld [vmem:[#allocation13 + $0x18] sm:$0xff] }
 0x2cb   : > { %v857_v7 = vmul.f32 %v2994_v5, %v2994_v5 }
 0x2cd   : > { %1760 = vmatmul.mubr.f32.vlgmr.msra.gmra.mrb[2].mxu0 %v857_v7  ;;  %v2061_v7 = vpack.c.bf16 %v677_v6, %v676_v4 }
 0x2ce   : > { %1829 = vmatprep.mubr.msk.f32.mxu0 %vm2534_vm0, %v2535_v1  ;;  %2035 = vmatpush3.bf16.msra.mxu0 %v2034_v29 }
 0x2cf   : > { %2036 = vmatprep.subr.bf16.mxu0 %v2533_v0 }
 0x2d2   : > { %2038 = vmatpush3.bf16.msra.mxu0 %v2037_v32  ;;  %v688_v32 = vld [vmem:[#allocation13 + $0x70] sm:$0xff] }
 0x2d3   : > { %2039 = vmatprep.subr.bf16.mxu0 %v2533_v0  ;;  %v2079_v34 = vpack.c.bf16 %v689_v33, %v688_v32 }
 0x2d6   : > { %2041 = vmatpush3.bf16.msra.mxu0 %v2040_v35  ;;  %v1513_v35 = vld [vmem:[%s3188_s23] ss:$0 sm:$0xff]  ;;  %s3088_s23 = scalar_lea.hbm %s3192_s14, %s1518_s9 }
 0x2d7   : > { %2042 = vmatprep.subr.bf16.mxu0 %v2533_v0 }
 0x2da   : > { %2044 = vmatpush3.bf16.msra.mxu0 %v2043_v39 }
 0x2db   : > { %2045 = vmatprep.subr.bf16.mxu0 %v2533_v0 }
 0x2de   : > { %2047 = vmatpush3.bf16.msra.mxu0 %v2046_v43 }
 0x2df   : > { %2048 = vmatprep.subr.bf16.mxu0 %v2533_v0 }
 0x2e2   : > { %2050 = vmatpush3.bf16.msra.mxu0 %v2049_v47 }
 0x2e3   : > { %2051 = vmatprep.subr.bf16.mxu0 %v2533_v0 }
 0x2e6   : > { %2053 = vmatpush3.bf16.msra.mxu0 %v2052_v51 }
 0x2e7   : > { %2054 = vmatprep.subr.bf16.mxu0 %v2533_v0 }
 0x2ea   : > { %2056 = vmatpush3.bf16.msra.mxu0 %v2055_v63 }
 0x2eb   : > { %2081 = vmatprep.subr.bf16.mxu0 %v2533_v0 }
 0x3a0   : > { %v924_v52 = vpop.f32.mrb[2].mxu0 }
 0x3a1   : > { %v925_v53 = vadd.f32 1e-05, %v924_v52  ;;  %v1761_v54 = vpop.f32.mrb[3].mxu0 }
 0x3a3   : > { %2236 = vrsqrt.f32 %v925_v53 }
 0x3ad   : > { %v2237_v55 = vpop.eup %2236 }
 0x3ae   : > { %v929_v57 = vmul.f32 %v2237_v55, %v2994_v5  ;;  %v2058_v5 = vpack.c.bf16 %v675_v3, %v674_v2 }
 0x3b0   : > { %v936_v59 = vmul.f32 %v1510_v56, %v929_v57 }
 0x3b2   : > { %v3019_v60 = vadd.f32 %v1511_v58, %v936_v59 }
 0x3b4   : > { %1795 = vmatmul.mubr.f32.vlgmr.msra.gmra.mrb[2].mxu1 %v3019_v60 }
 0x3b5   : > { %1864 = vmatprep.mubr.msk.f32.mxu1 %vm2534_vm0, %v2535_v1  ;;  %2059 = vmatpush3.bf16.msra.mxu1 %v2058_v5 }
 0x3b6   : > { %2060 = vmatprep.subr.bf16.mxu1 %v2533_v0 }
 0x3b9   : > { %2062 = vmatpush3.bf16.msra.mxu1 %v2061_v7 }
 0x3ba   : > { %2063 = vmatprep.subr.bf16.mxu1 %v2533_v0 }
 0x3bd   : > { %2065 = vmatpush3.bf16.msra.mxu1 %v2064_v10 }
 0x3be   : > { %2066 = vmatprep.subr.bf16.mxu1 %v2533_v0 }
 0x3c1   : > { %2068 = vmatpush3.bf16.msra.mxu1 %v2067_v13 }
 0x3c2   : > { %2069 = vmatprep.subr.bf16.mxu1 %v2533_v0 }
 0x3c5   : > { %2071 = vmatpush3.bf16.msra.mxu1 %v2070_v17 }
 0x3c6   : > { %2072 = vmatprep.subr.bf16.mxu1 %v2533_v0 }
 0x3c9   : > { %2074 = vmatpush3.bf16.msra.mxu1 %v2073_v21 }
 0x3ca   : > { %2075 = vmatprep.subr.bf16.mxu1 %v2533_v0 }
 0x3cd   : > { %2077 = vmatpush3.bf16.msra.mxu1 %v2076_v25 }
 0x3ce   : > { %2078 = vmatprep.subr.bf16.mxu1 %v2533_v0 }
 0x3d1   : > { %2080 = vmatpush3.bf16.msra.mxu1 %v2079_v34 }
 0x3d2   : > { %2105 = vmatprep.subr.bf16.mxu1 %v2533_v0 }
 0x487   : > { %v1016_v27 = vpop.f32.mrb[2].mxu1 }
 0x488   : > { %v1017_v28 = vadd.f32 %v1512_v26, %v1016_v27  ;;  %v1796_v29 = vpop.f32.mrb[3].mxu1 }
 0x48a   : > { %v1020_v31 = vmax.f32 %v1017_v28, 0.0 }
 0x48c   : > { %1830 = vmatmul.mubr.f32.vlgmr.msra.gmra.mrb[4].mxu0 %v1020_v31 }
 0x48d   : > { %2083 = vmatpush3.bf16.msra.mxu0 %v2925_v15  ;;  %1899 = vmatprep.mubr.msk.f32.mxu0 %vm2534_vm0, %v2535_v1 }
 0x48e   : > { %2084 = vmatprep.subr.bf16.mxu0 %v2533_v0 }
 0x491   : > { %2086 = vmatpush3.bf16.msra.mxu0 %v2929_v18 }
 0x492   : > { %2087 = vmatprep.subr.bf16.mxu0 %v2533_v0 }
 0x495   : > { %2089 = vmatpush3.bf16.msra.mxu0 %v2934_v24 }
 0x496   : > { %2090 = vmatprep.subr.bf16.mxu0 %v2533_v0 }
 0x499   : > { %2092 = vmatpush3.bf16.msra.mxu0 %v2939_v30 }
 0x49a   : > { %2093 = vmatprep.subr.bf16.mxu0 %v2533_v0 }
 0x49d   : > { %2095 = vmatpush3.bf16.msra.mxu0 %v2944_v36 }
 0x49e   : > { %2096 = vmatprep.subr.bf16.mxu0 %v2533_v0 }
 0x4a1   : > { %2098 = vmatpush3.bf16.msra.mxu0 %v2949_v42 }
 0x4a2   : > { %2099 = vmatprep.subr.bf16.mxu0 %v2533_v0 }
 0x4a5   : > { %2101 = vmatpush3.bf16.msra.mxu0 %v2954_v46 }
 0x4a6   : > { %2102 = vmatprep.subr.bf16.mxu0 %v2533_v0 }
 0x4a9   : > { %2104 = vmatpush3.bf16.msra.mxu0 %v2978_v50 }
 0x55f   : > { %v1093_v37 = vpop.f32.mrb[4].mxu0 }
 0x560   : > { %v1094_v38 = vadd.f32 %v1513_v35, %v1093_v37  ;;  %v1831_v39 = vpop.f32.mrb[5].mxu0 }
 0x562   : > { %v1097_v40 = vmax.f32 %v1094_v38, 0.0 }
 0x564   : > { %1865 = vmatmul.mubr.f32.vlgmr.msra.gmra.mrb[4].mxu1 %v1097_v40 }
 0x565   : > { %2107 = vmatpush3.bf16.msra.mxu1 %v2925_v15  ;;  %1934 = vmatprep.mubr.msk.f32.mxu1 %vm2534_vm0, %v2535_v1  ;;  %v1514_v1 = vld [vmem:[%s3189_s6] ss:$0 sm:$0xff]  ;;  %s2446_s6 = scalar_lea.vmem %s2445_s11, 256 }
 0x566   : > { %2108 = vmatprep.subr.bf16.mxu1 %v2533_v0  ;;  %p2448_p9 = scmp.lt.s32.totalorder %s2446_s6, %s2440_s30 }
 0x568   : > { %p2449_p3 = por %p2448_p9, %p2447_p5 }
 0x569   : > { %2110 = vmatpush3.bf16.msra.mxu1 %v2929_v18 }
 0x56a   : > { %2111 = vmatprep.subr.bf16.mxu1 %v2533_v0  ;;  %p2450_p7 = pnand %p2449_p3, %p2443_p10 }
 0x56d   : > { %2113 = vmatpush3.bf16.msra.mxu1 %v2934_v24 }
 0x56e   : > { %2114 = vmatprep.subr.bf16.mxu1 %v2533_v0 }
 0x571   : > { %2116 = vmatpush3.bf16.msra.mxu1 %v2939_v30 }
 0x572   : > { %2117 = vmatprep.subr.bf16.mxu1 %v2533_v0 }
 0x575   : > { %2119 = vmatpush3.bf16.msra.mxu1 %v2944_v36 }
 0x576   : > { %2120 = vmatprep.subr.bf16.mxu1 %v2533_v0 }
 0x579   : > { %2122 = vmatpush3.bf16.msra.mxu1 %v2949_v42 }
 0x57a   : > { %2123 = vmatprep.subr.bf16.mxu1 %v2533_v0 }
 0x57d   : > { %2125 = vmatpush3.bf16.msra.mxu1 %v2954_v46 }
 0x57e   : > { %2126 = vmatprep.subr.bf16.mxu1 %v2533_v0 }
 0x581   : > { %2128 = vmatpush3.bf16.msra.mxu1 %v2978_v50 }
 0x637   : > { %v1170_v15 = vpop.f32.mrb[4].mxu1 }
 0x638   : > { %v1171_v18 = vadd.f32 %v1514_v1, %v1170_v15  ;;  %v1866_v24 = vpop.f32.mrb[5].mxu1 }
 0x63a   : > { %v1174_v30 = vadd.f32 %v1171_v18, %v3019_v60 }
 0x63c   : > { %1900 = vmatmul.mubr.f32.vlgmr.msra.gmra.mrb[6].mxu0 %v1174_v30 }
 0x70f   : > { %v1241_v36 = vpop.f32.mrb[6].mxu0 }
 0x710   : > { %v1245_v42 = vsub.f32 %v1174_v30, %v1241_v36  ;;  %v1901_v41 = vpop.f32.mrb[7].mxu0 }
 0x712   : > { %v1246_v46 = vmul.f32 %v1245_v42, %v1245_v42 }
 0x714   : > { %1935 = vmatmul.mubr.f32.vlgmr.msra.gmra.mrb[6].mxu1 %v1246_v46 }
 0x7e7   : > { %v1313_v0 = vpop.f32.mrb[6].mxu1 }
 0x7e8   : > { %v1314_v50 = vadd.f32 1e-05, %v1313_v0  ;;  %v1936_v43 = vpop.f32.mrb[7].mxu1 }
 0x7ea   : > { %2238 = vrsqrt.f32 %v1314_v50 }
 0x7f4   : > { %v2239_v44 = vpop.eup %2238 }
 0x7f5   : > { %v1318_v47 = vmul.f32 %v2239_v44, %v1245_v42 }
 0x7f7   : > { %v1325_v49 = vmul.f32 %v1515_v45, %v1318_v47 }
 0x7f9   : > { %v1332_v51 = vadd.f32 %v1516_v48, %v1325_v49 }
 0x7fb   : > { %1333 = vst [vmem:[%s618_s17] sm:$0xff] %v1332_v51 }
 0x7fc   : > { %2453 = shalt.err (!%p2450_p7)
}
 0x7fd   : > { %s2454_s7 = scalar_lea.hbm %s3088_s23, 128  ;;  %s2458_s2 = scalar_lea.hbm %s3192_s14, 256 }
 0x7fe   : > { %p2455_p11 = scmp.ne.s32.totalorder %s3088_s23, %s2454_s7  ;;  %p2459_p12 = scmp.lt.u32.totalorder %s3088_s23, %s3192_s14 }
 0x7ff   : > { %p2460_p1 = scmp.lt.u32.totalorder %s2458_s2, %s2454_s7  ;;  %p2462_p0 = scmp.lt.u32.totalorder %s2454_s7, %s3088_s23 }
 0x800   : > { %p2456_p8 = pnand %p2455_p11, %p3193_p2 }
 0x801   : > { %p2461_p13 = por %p2460_p1, %p2459_p12 }
 0x802   : > { %p2457_p4 = pneg %p2456_p8 }
 0x803   : > { %p2463_p6 = por %p2462_p0, %p2461_p13 }
 0x805   : > { %p2464_p10 = pnand %p2463_p6, %p2457_p4 }
 0x807   : > { %2467 = shalt.err (!%p2464_p10)
}
 0x808   : > { %2153 = dma.vmem_to_hbm [thread:$0]  (%p3193_p2), %s3090_s27, 128, %s3088_s23, %s1335_s25  }
 0x809 PF: > { %s1360_s22 = sand.u32 1, %s2510_s18   ;;  %p3194_p5 = scmp.ne.s32.totalorder %s3176_s16, 0 }
 0x80a   : > { %p3195_p9 = scmp.ge.s32.totalorder %s2522_s21, 2  ;;  %s1361_s9 = scalar_lea.sflag [#allocation4], %s1360_s22 }
 0x80c   : > { %p2179_p3 = pnand %p3195_p9, %p3194_p5 }
 0x80e   : > { %2505 = dma.done.wait (!%p2179_p3), %s1361_s9, 128  }
 0x80f   : > { %2507 = vsyncadd (!%p2179_p3), %s1361_s9, 4294967168  ;;  %p33_p7 = scmp.ge.s32.totalorder %s2790_s26, 4   ;;  %s3196_s18 = smov %s2514_s19 }
 0x810   : > { %s3197_s19 = smov %s2518_s20  ;;  %s3198_s20 = smov %s2802_s8 }
 0x811   : > { %s3199_s21 = smov %s2790_s26  ;;  %35 = sbr.rel (!%p33_p7) target bundleno = 22 (0x16), region = 158 }
 0x818   :  { %1366 = vsyncpa [#allocation3], 1 }
 0x819   :  { %1368 = vsyncpa [#allocation3 + $0x1], 1 }
 0x81a   :  { %1369 = vsyncpa [#allocation6], 1 }
 0x81b   :  { %1371 = vsyncpa [#allocation6 + $0x1], 1 }
 0x81c   :  { %1372 = vsyncpa [#allocation9], 1 }
 0x81d   :  { %1373 = vsyncpa [#allocation12], 1 }
 0x81e   :  { %1374 = vsyncpa [#allocation4], 1 }
 0x81f   :  { %1376 = vsyncpa [#allocation4 + $0x1], 1 }

// kernel: tpu_custom_call.1
= control target key start
LH: loop header
LB: loop body
LE: loop exit
PB: predicated region body
PF: predicated region fallthrough
CT: control target
= control target key end

     0   :  { %s3132_s0 = inlined_call_operand.hbm [shape: f32[12,128], index: 0, kind: input, shape index: {}]   ;;  %s3133_s1 = inlined_call_operand.hbm [shape: f32[12,128], index: 1, kind: input, shape index: {}]   ;;  %s3134_s2 = inlined_call_operand.hbm [shape: f32[128,128], index: 2, kind: input, shape index: {}]   ;;  %s3135_s3 = inlined_call_operand.hbm [shape: f32[128,128], index: 3, kind: input, shape index: {}]   ;;  %s3136_s4 = inlined_call_operand.vmem [shape: f32[1,128], index: 4, kind: input, shape index: {}]   ;;  %s3137_s5 = inlined_call_operand.vmem [shape: f32[1,128], index: 5, kind: input, shape index: {}]   ;;  %s3138_s6 = inlined_call_operand.vmem [shape: f32[1,128], index: 6, kind: input, shape index: {}]   ;;  %s3139_s7 = inlined_call_operand.hbm [shape: f32[128,128], index: 7, kind: input, shape index: {}]   ;;  %s3140_s8 = inlined_call_operand.vmem [shape: f32[1,128], index: 8, kind: input, shape index: {}]   ;;  %s3141_s9 = inlined_call_operand.hbm [shape: f32[128,128], index: 9, kind: input, shape index: {}]   ;;  %s3142_s10 = inlined_call_operand.vmem [shape: f32[1,128], index: 10, kind: input, shape index: {}]   ;;  %s3143_s11 = inlined_call_operand.hbm [shape: f32[128,128], index: 11, kind: input, shape index: {}]   ;;  %s3144_s12 = inlined_call_operand.vmem [shape: f32[1,128], index: 12, kind: input, shape index: {}]   ;;  %s3145_s13 = inlined_call_operand.vmem [shape: f32[1,128], index: 13, kind: input, shape index: {}]   ;;  %s3146_s14 = inlined_call_operand.vmem [shape: f32[1,128], index: 14, kind: input, shape index: {}]   ;;  %s3147_s15 = inlined_call_operand.hbm [shape: f32[12,128], index: 15, kind: output, shape index: {}]  }
   0x1   :  { %3153 = sst [smem:[#allocation21_spill]] %s3134_s2 }
   0x2   :  { %3154 = sst [smem:[#allocation22_spill]] %s3135_s3 }
   0x3   :  { %3155 = sst [smem:[#allocation23_spill]] %s3138_s6 }
   0x4   :  { %3156 = sst [smem:[#allocation24_spill]] %s3139_s7 }
   0x5   :  { %3157 = sst [smem:[#allocation25_spill]] %s3140_s8 }
   0x6   :  { %3158 = sst [smem:[#allocation26_spill]] %s3141_s9 }
   0x7   :  { %3159 = sst [smem:[#allocation27_spill]] %s3142_s10 }
   0x8   :  { %3160 = sst [smem:[#allocation28_spill]] %s3143_s11 }
   0x9   :  { %3161 = sst [smem:[#allocation29_spill]] %s3144_s12 }
   0xa   :  { %3162 = sst [smem:[#allocation30_spill]] %s3145_s13 }
   0xb   :  { %3163 = sst [smem:[#allocation31_spill]] %s3146_s14 }
   0xc   :  { %3164 = sst [smem:[#allocation32_spill]] %s3147_s15 }
   0xd   :  { %20 = vsyncpa [#allocation3], 0 }
   0xe   :  { %22 = vsyncpa [#allocation3 + $0x1], 0 }
   0xf   :  { %23 = vsyncpa [#allocation6], 0 }
  0x10   :  { %25 = vsyncpa [#allocation6 + $0x1], 0 }
  0x11   :  { %26 = vsyncpa [#allocation9], 0 }
  0x12   :  { %27 = vsyncpa [#allocation12], 0 }
  0x13   :  { %28 = vsyncpa [#allocation4], 0 }
  0x14   :  { %30 = vsyncpa [#allocation4 + $0x1], 0  ;;  %s2617_s18 = smov 0   ;;  %s2619_s19 = smov 0  }
  0x15   :  { %s2621_s20 = smov 0   ;;  %s2623_s21 = smov 0  }
  0x16 LB: > { %s2524_s22 = smov [#allocation7]   ;;  %s2638_s24 = sadd.s32 4294967295, %s2522_s21   ;;  %s2522_s21 = sphi %s2623_s21, %s3199_s21   ;;  %s2518_s20 = sphi %s2621_s20, %s3198_s20   ;;  %s2514_s19 = sphi %s2619_s19, %s3197_s19   ;;  %s2510_s18 = sphi %s2617_s18, %s3196_s18  }
  0x17   : > { %s404_s23 = sshll.u32 %s2524_s22, 4  ;;  %p1489_p0 = scmp.ge.s32.totalorder %s2522_s21, 1  ;;  %s2643_s23 = int_to_ptr.vmem [resolvable:$true] %s404_s23 }
  0x18   : > { %p3149_p1 = scmp.eq.s32.totalorder %s2638_s24, 0  ;;  %p392_p2 = scmp.lt.s32.totalorder %s2522_s21, 3 }
  0x19   : > { %s2525_s26 = smov [#allocation8]   ;;  %s2526_s29 = smov [#allocation11]  }
  0x1a   : > { %p2645_p3 = pnand %p1489_p0, %p392_p2  ;;  %s417_s27 = sshll.u32 %s2525_s26, 4  ;;  %s2658_s27 = int_to_ptr.vmem [resolvable:$true] %s417_s27 }
  0x1b   : > { %s455_s30 = sshll.u32 %s2526_s29, 4  ;;  %s3167_s2 = sld [smem:[#allocation21_spill]]  ;;  %s2660_s30 = int_to_ptr.vmem [resolvable:$true] %s455_s30 }
  0x1c   : > { %s3165_s25 = scalar_select %p2645_p3, 1, 0 }
  0x1d   : > { %p2155_p5 = pneg %p2645_p3 }
  0x1f   : > { %p2654_p6 = pnand %p2155_p5, %p3149_p1 }
  0x21   : > { %s2240_s22 = scalar_lea.hbm %s3167_s2, 2048  ;;  %p2670_p8 = pneg %p2654_p6 }
  0x22   : > { %p2241_p7 = scmp.ne.s32.totalorder %s3167_s2, %s2240_s22  ;;  %p2247_p11 = scmp.lt.u32.totalorder %s2240_s22, %s3167_s2 }
  0x24   : > { %p2243_p9 = pnand %p2670_p8, %p2241_p7 }
  0x26   : > { %p2244_p10 = pneg %p2243_p9 }
  0x28   : > { %p2249_p12 = pnand %p2247_p11, %p2244_p10 }
  0x2a   : > { %2252 = shalt.err (!%p2249_p12)
}
  0x2b   : > { %s2253_s14 = scalar_lea.vmem %s2643_s23, 2048  ;;  %p2261_p5 = scmp.lt.s32.totalorder %s2643_s23, %s2643_s23 }
  0x2c   : > { %p2254_p13 = scmp.ne.s32.totalorder %s2643_s23, %s2253_s14  ;;  %p2262_p4 = scmp.lt.s32.totalorder %s2253_s14, %s2253_s14 }
  0x2e   : > { %p2256_p0 = pnand %p2254_p13, %p2670_p8  ;;  %p2263_p7 = por %p2262_p4, %p2261_p5 }
  0x30   : > { %p2257_p2 = pneg %p2256_p0 }
  0x32   : > { %p2264_p9 = pnand %p2263_p7, %p2257_p2 }
  0x34   : > { %2267 = shalt.err (!%p2264_p9)
}
  0x35   : > { %s2527_s15 = smov 128   ;;  %s2528_s13 = smov 8  }
  0x36   : > { %2158 = dma.hbm_to_vmem [thread:$0]  (!%p2654_p6), %s3167_s2, 2048, %s2643_s23, [#allocation6], %s2527_s15, %s2527_s15, %s2528_s13  }
  0x37   : > { %s3169_s3 = sld [smem:[#allocation22_spill]] }
  0x3d   : > { %s2268_s14 = scalar_lea.hbm %s3169_s3, 2048 }
  0x3e   : > { %p2269_p4 = scmp.ne.s32.totalorder %s3169_s3, %s2268_s14  ;;  %p2275_p12 = scmp.lt.u32.totalorder %s2268_s14, %s3169_s3 }
  0x40   : > { %p2271_p10 = pnand %p2269_p4, %p2670_p8 }
  0x42   : > { %p2272_p11 = pneg %p2271_p10 }
  0x44   : > { %p2277_p13 = pnand %p2275_p12, %p2272_p11 }
  0x46   : > { %2280 = shalt.err (!%p2277_p13)
}
  0x47   : > { %s2281_s23 = scalar_lea.vmem %s2658_s27, 2048  ;;  %p2289_p7 = scmp.lt.s32.totalorder %s2658_s27, %s2658_s27 }
  0x48   : > { %p2282_p0 = scmp.ne.s32.totalorder %s2658_s27, %s2281_s23  ;;  %p2290_p9 = scmp.lt.s32.totalorder %s2281_s23, %s2281_s23 }
  0x4a   : > { %p2284_p2 = pnand %p2282_p0, %p2670_p8  ;;  %p2291_p4 = por %p2290_p9, %p2289_p7 }
  0x4c   : > { %p2285_p5 = pneg %p2284_p2 }
  0x4e   : > { %p2292_p10 = pnand %p2291_p4, %p2285_p5 }
  0x50   : > { %2295 = shalt.err (!%p2292_p10)
}
  0x51   : > { %2161 = dma.hbm_to_vmem [thread:$0]  (!%p2654_p6), %s3169_s3, 2048, %s2658_s27, [#allocation9], %s2527_s15, %s2527_s15, %s2528_s13  }
  0x52   : > { %s3170_s9 = sld [smem:[#allocation26_spill]] }
  0x58   : > { %s2296_s16 = scalar_lea.hbm %s3170_s9, 2048 }
  0x59   : > { %p2297_p11 = scmp.ne.s32.totalorder %s3170_s9, %s2296_s16  ;;  %p2303_p0 = scmp.lt.u32.totalorder %s2296_s16, %s3170_s9 }
  0x5b   : > { %p2299_p12 = pnand %p2297_p11, %p2670_p8 }
  0x5d   : > { %p2300_p13 = pneg %p2299_p12 }
  0x5f   : > { %p2305_p2 = pnand %p2303_p0, %p2300_p13 }
  0x61   : > { %2308 = shalt.err (!%p2305_p2)
}
  0x62   : > { %s2309_s27 = scalar_lea.vmem %s2660_s30, 2048  ;;  %p2317_p4 = scmp.lt.s32.totalorder %s2660_s30, %s2660_s30 }
  0x63   : > { %p2310_p5 = scmp.ne.s32.totalorder %s2660_s30, %s2309_s27  ;;  %p2318_p10 = scmp.lt.s32.totalorder %s2309_s27, %s2309_s27 }
  0x65   : > { %p2312_p7 = pnand %p2310_p5, %p2670_p8  ;;  %p2319_p11 = por %p2318_p10, %p2317_p4 }
  0x67   : > { %p2313_p9 = pneg %p2312_p7 }
  0x69   : > { %p2320_p12 = pnand %p2319_p11, %p2313_p9 }
  0x6b   : > { %2323 = shalt.err (!%p2320_p12)
}
  0x6c   : > { %2167 = dma.hbm_to_vmem [thread:$0]  (!%p2654_p6), %s3170_s9, 2048, %s2660_s30, [#allocation12], %s2527_s15, %s2527_s15, %s2528_s13  }
  0x6d   : > { %s2529_s8 = smov [#allocation10]   ;;  %s2530_s12 = smov [#allocation13]  }
  0x6e   : > { %s439_s10 = sshll.u32 %s2529_s8, 4  ;;  %s471_s16 = sshll.u32 %s2530_s12, 4  ;;  %s440_s10 = int_to_ptr.vmem [resolvable:$true] %s439_s10  ;;  %s472_s16 = int_to_ptr.vmem [resolvable:$true] %s471_s16 }
  0x6f   : > { %s3171_s7 = sld [smem:[#allocation24_spill]] }
  0x75   : > { %s2324_s29 = scalar_lea.hbm %s3171_s7, 2048 }
  0x76   : > { %p2325_p13 = scmp.ne.s32.totalorder %s3171_s7, %s2324_s29  ;;  %p2331_p5 = scmp.lt.u32.totalorder %s2324_s29, %s3171_s7 }
  0x78   : > { %p2327_p0 = pnand %p2325_p13, %p2670_p8 }
  0x7a   : > { %p2328_p2 = pneg %p2327_p0 }
  0x7c   : > { %p2333_p7 = pnand %p2331_p5, %p2328_p2 }
  0x7e   : > { %2336 = shalt.err (!%p2333_p7)
}
  0x7f   : > { %s2337_s30 = scalar_lea.vmem %s440_s10, 2048  ;;  %p2345_p11 = scmp.lt.s32.totalorder %s440_s10, %s440_s10 }
  0x80   : > { %p2338_p9 = scmp.ne.s32.totalorder %s440_s10, %s2337_s30  ;;  %p2346_p12 = scmp.lt.s32.totalorder %s2337_s30, %s2337_s30 }
  0x82   : > { %p2340_p4 = pnand %p2338_p9, %p2670_p8  ;;  %p2347_p1 = por %p2346_p12, %p2345_p11 }
  0x84   : > { %p2341_p10 = pneg %p2340_p4 }
  0x86   : > { %p2348_p3 = pnand %p2347_p1, %p2341_p10 }
  0x88   : > { %2351 = shalt.err (!%p2348_p3)
}
  0x89   : > { %2164 = dma.hbm_to_vmem [thread:$0]  (!%p2654_p6), %s3171_s7, 2048, %s440_s10, [#allocation9], %s2527_s15, %s2527_s15, %s2528_s13  }
  0x8a   : > { %s3172_s11 = sld [smem:[#allocation28_spill]] }
  0x90   : > { %s2352_s17 = scalar_lea.hbm %s3172_s11, 2048 }
  0x91   : > { %p2353_p1 = scmp.ne.s32.totalorder %s3172_s11, %s2352_s17  ;;  %p2359_p0 = scmp.lt.u32.totalorder %s2352_s17, %s3172_s11 }
  0x93   : > { %p2355_p3 = pnand %p2353_p1, %p2670_p8 }
  0x95   : > { %p2356_p13 = pneg %p2355_p3 }
  0x97   : > { %p2361_p2 = pnand %p2359_p0, %p2356_p13 }
  0x99   : > { %2364 = shalt.err (!%p2361_p2)
}
  0x9a   : > { %s2365_s23 = scalar_lea.vmem %s472_s16, 2048  ;;  %p2373_p4 = scmp.lt.s32.totalorder %s472_s16, %s472_s16 }
  0x9b   : > { %p2366_p5 = scmp.ne.s32.totalorder %s472_s16, %s2365_s23  ;;  %p2374_p10 = scmp.lt.s32.totalorder %s2365_s23, %s2365_s23 }
  0x9d   : > { %p2368_p7 = pnand %p2366_p5, %p2670_p8  ;;  %p2375_p11 = por %p2374_p10, %p2373_p4 }
  0x9f   : > { %p2369_p9 = pneg %p2368_p7 }
  0xa1   : > { %p2376_p12 = pnand %p2375_p11, %p2369_p9 }
  0xa3   : > { %2379 = shalt.err (!%p2376_p12)
}
  0xa4   : > { %2170 = dma.hbm_to_vmem [thread:$0]  (!%p2654_p6), %s3172_s11, 2048, %s472_s16, [#allocation12], %s2527_s15, %s2527_s15, %s2528_s13  }
  0xa5   : > { %s1488_s28 = sadd.s32 4294967294, %s2522_s21   ;;  %s2790_s26 = sadd.s32 1, %s2522_s21  }
  0xa6   : > { %s43_s2 = sadd.s32 1, %s2518_s20  ;;  %s40_s6 = ssub.s32 %s2522_s21, %s2790_s26 }
  0xa7   : > { %p50_p8 = scmp.ne.s32.totalorder %s2518_s20, %s2514_s19  ;;  %p41_p1 = scmp.eq.s32.totalorder %s40_s6, 0 }
  0xa8   : > { %p51_p3 = scmp.eq.s32.totalorder %s2522_s21, 0  ;;  %p56_p13 = scmp.ne.s32.totalorder %s2514_s19, %s2510_s18 }
  0xa9   : > { %p379_p0 = scmp.eq.s32.totalorder %s2638_s24, 1  ;;  %p3173_p5 = scmp.eq.s32.totalorder %s2638_s24, 0 }
  0xaa   : > { %s2802_s8 = scalar_select %p41_p1, %s2518_s20, %s43_s2  }
  0xab   : > { %p52_p2 = por %p51_p3, %p50_p8  ;;  %p2806_p7 = por %p3173_p5, %p56_p13 }
  0xac   : > { %p2810_p6 = por %p379_p0, %p50_p8  ;;  %p385_p9 = scmp.eq.s32.totalorder %s1488_s28, 1 }
  0xad   : > { %s3174_s12 = scalar_select %p2806_p7, 1, 0 }
  0xae   : > { %s3175_s15 = scalar_select %p2810_p6, 1, 0 }
  0xaf   : > { %p2187_p4 = scmp.lt.s32.totalorder %s2522_s21, 2  ;;  %s494_s13 = sand.u32 1, %s2518_s20  }
  0xb0   : > { %p2816_p10 = por %p385_p9, %p56_p13  ;;  %s2820_s17 = sshll.u32 %s494_s13, 3 }
  0xb1   : > { %s1497_s22 = sshll.u32 %s2522_s21, 7  ;;  %s498_s23 = scalar_lea.vmem [#allocation2], %s2820_s17 }
  0xb2   : > { %s3176_s16 = scalar_select %p2816_p10, 1, 0 }
  0xb3   : > { %s2826_s27 = scalar_lea.hbm %s3132_s0, %s1497_s22  ;;  %s505_s10 = sshll.u32 %s498_s23, 4  ;;  %s2833_s10 = int_to_ptr.vmem [resolvable:$true] %s505_s10 }
  0xb4   : > { %p2829_p11 = pnand %p2187_p4, %p52_p2  ;;  %s2838_s6 = scalar_lea.hbm %s3133_s1, %s1497_s22 }
  0xb5   : > { %s495_s29 = scalar_lea.sflag [#allocation3], %s494_s13  ;;  %s2380_s14 = scalar_lea.hbm %s2826_s27, 128 }
  0xb6   : > { %p2381_p12 = scmp.ne.s32.totalorder %s2826_s27, %s2380_s14  ;;  %p2382_p8 = pneg %p2829_p11 }
  0xb7   : > { %s2385_s7 = scalar_lea.hbm %s3132_s0, 256  ;;  %p2386_p13 = scmp.lt.u32.totalorder %s2826_s27, %s3132_s0 }
  0xb8   : > { %p2383_p1 = pnand %p2382_p8, %p2381_p12  ;;  %p2387_p0 = scmp.lt.u32.totalorder %s2385_s7, %s2380_s14 }
  0xb9   : > { %p2389_p5 = scmp.lt.u32.totalorder %s2380_s14, %s2826_s27 }
  0xba   : > { %p2384_p3 = pneg %p2383_p1  ;;  %p2388_p2 = por %p2387_p0, %p2386_p13 }
  0xbc   : > { %p2390_p9 = por %p2389_p5, %p2388_p2 }
  0xbe   : > { %p2391_p4 = pnand %p2390_p9, %p2384_p3 }
  0xc0   : > { %2394 = shalt.err (!%p2391_p4)
}
  0xc1   : > { %s2395_s13 = scalar_lea.vmem %s2833_s10, 128  ;;  %s2531_s3 = smov [#allocation2]  }
  0xc2   : > { %p2396_p12 = scmp.ne.s32.totalorder %s2833_s10, %s2395_s13  ;;  %s2400_s22 = sshll.u32 %s2531_s3, 4  ;;  %s2401_s22 = int_to_ptr.vmem [resolvable:$false] %s2400_s22 }
  0xc3   : > { %s2402_s9 = scalar_lea.vmem %s2401_s22, 256  ;;  %p2403_p6 = scmp.lt.s32.totalorder %s2833_s10, %s2401_s22 }
  0xc4   : > { %p2398_p1 = pnand %p2396_p12, %p2382_p8  ;;  %p2404_p13 = scmp.lt.s32.totalorder %s2402_s9, %s2395_s13 }
  0xc6   : > { %p2399_p10 = pneg %p2398_p1  ;;  %p2405_p0 = por %p2404_p13, %p2403_p6 }
  0xc8   : > { %p2406_p2 = pnand %p2405_p0, %p2399_p10 }
  0xca   : > { %2409 = shalt.err (!%p2406_p2)
}
  0xcb   : > { %2174 = dma.hbm_to_vmem [thread:$0]  (!%p2829_p11), %s2826_s27, 128, %s2833_s10, %s495_s29  }
  0xcc   : > { %s512_s7 = sand.u32 1, %s2522_s21   ;;  %s516_s11 = scalar_lea.vmem [#allocation5], %s2820_s17 }
  0xcd   : > { %s523_s28 = sshll.u32 %s516_s11, 4  ;;  %s513_s2 = scalar_lea.sflag [#allocation6], %s512_s7  ;;  %s524_s28 = int_to_ptr.vmem [resolvable:$true] %s523_s28 }
  0xce   : > { %s2410_s14 = scalar_lea.hbm %s2838_s6, 128  ;;  %s2415_s3 = scalar_lea.hbm %s3133_s1, 256 }
  0xcf   : > { %p2411_p6 = scmp.ne.s32.totalorder %s2838_s6, %s2410_s14  ;;  %p2416_p5 = scmp.lt.u32.totalorder %s2838_s6, %s3133_s1 }
  0xd0   : > { %p2417_p9 = scmp.lt.u32.totalorder %s2415_s3, %s2410_s14  ;;  %p2419_p12 = scmp.lt.u32.totalorder %s2410_s14, %s2838_s6 }
  0xd1   : > { %p2413_p10 = pnand %p2411_p6, %p2382_p8 }
  0xd2   : > { %p2418_p4 = por %p2417_p9, %p2416_p5 }
  0xd3   : > { %p2414_p3 = pneg %p2413_p10 }
  0xd4   : > { %p2420_p1 = por %p2419_p12, %p2418_p4 }
  0xd6   : > { %p2421_p13 = pnand %p2420_p1, %p2414_p3 }
  0xd8   : > { %2424 = shalt.err (!%p2421_p13)
}
  0xd9   : > { %s2425_s17 = scalar_lea.vmem %s524_s28, 128  ;;  %s2532_s27 = smov [#allocation5]  }
  0xda   : > { %p2426_p0 = scmp.ne.s32.totalorder %s524_s28, %s2425_s17  ;;  %s2430_s10 = sshll.u32 %s2532_s27, 4  ;;  %s2431_s10 = int_to_ptr.vmem [resolvable:$false] %s2430_s10 }
  0xdb   : > { %s2432_s29 = scalar_lea.vmem %s2431_s10, 256  ;;  %p2433_p10 = scmp.lt.s32.totalorder %s524_s28, %s2431_s10 }
  0xdc   : > { %p2428_p2 = pnand %p2426_p0, %p2382_p8  ;;  %p2434_p7 = scmp.lt.s32.totalorder %s2432_s29, %s2425_s17 }
  0xde   : > { %p2429_p6 = pneg %p2428_p2  ;;  %p2435_p5 = por %p2434_p7, %p2433_p10 }
  0xe0   : > { %p2436_p9 = pnand %p2435_p5, %p2429_p6 }
  0xe2   : > { %2439 = shalt.err (!%p2436_p9)
}
  0xe3   : > { %2177 = dma.hbm_to_vmem [thread:$0]  (!%p2829_p11), %s2838_s6, 128, %s524_s28, %s513_s2  }
  0xe4   : > { %p3178_p3 = scmp.ne.s32.totalorder %s3165_s25, 0 }
  0xe5   : > { %s2889_s7 = sand.u32 (!%p3178_p3), 1, %s2514_s19   ;;  %p3179_p7 = scmp.ne.s32.totalorder (!%p3178_p3), %s3174_s12, 0 }
  0xe6   : > { %532 = sbr.rel (%p3178_p3) target bundleno = 2057 (0x809), region = 80  ;;  %s2892_s11 = sshll.u32 (!%p3178_p3), %s2889_s7, 3 }
  0xe7   : > { %s535_s14 = scalar_lea.sflag (!%p3178_p3), [#allocation3], %s2889_s7  ;;  %s538_s23 = scalar_lea.vmem (!%p3178_p3), [#allocation2], %s2892_s11 }
  0xed   : > { %2485 = dma.done.wait (%p3179_p7), %s535_s14, 128  }
  0xee   : > { %2487 = vsyncadd (%p3179_p7), %s535_s14, 4294967168  ;;  %s543_s25 = sand.u32 1, %s2638_s24   ;;  %s547_s6 = scalar_lea.vmem [#allocation5], %s2892_s11 }
  0xef   : > { %s544_s30 = scalar_lea.sflag [#allocation6], %s543_s25 }
  0xf0   : > { %2489 = dma.done.wait (%p3179_p7), %s544_s30, 128  }
  0xf1   : > { %2491 = vsyncadd (%p3179_p7), %s544_s30, 4294967168  ;;  %p3180_p11 = scmp.eq.s32.totalorder %s2638_s24, 0 }
  0xf3   : > { %2493 = dma.done.wait (%p3180_p11), [#allocation6], 2048   ;;  %p3181_p8 = pmov %p3180_p11 }
  0xf5   : > { %2495 = vsyncadd (%p3181_p8), [#allocation6], 4294965248  ;;  %p3182_p4 = pmov %p3181_p8 }
  0xf7   : > { %2497 = dma.done.wait (%p3182_p4), [#allocation9], 4096   ;;  %p3183_p12 = pmov %p3182_p4 }
  0xf8   : > { %p3184_p1 = pmov %p3182_p4 }
  0xf9   : > { %2499 = vsyncadd (%p3183_p12), [#allocation9], 4294963200 }
  0xfa   : > { %2501 = dma.done.wait (%p3184_p1), [#allocation12], 4096   ;;  %p3185_p13 = pmov %p3184_p1 }
  0xfb   : > { %v2533_v0 = vmov 0.0|0.0   ;;  %vm2534_vm0 = vmmov 0   ;;  %v2535_v1 = vmov 0.0   ;;  %v621_v2 = vld [vmem:[#allocation8] sm:$0xff]  ;;  %v622_v3 = vld [vmem:[#allocation8 + $0x8] sm:$0xff]  ;;  %v623_v4 = vld [vmem:[#allocation8 + $0x10] sm:$0xff] }
  0xfc   : > { %2503 = vsyncadd (%p3185_p13), [#allocation12], 4294963200  ;;  %1937 = vmatprep.subr.bf16.mxu0 %v2533_v0  ;;  %1689 = vmatprep.mubr.msk.f32.mxu0 %vm2534_vm0, %v2535_v1  ;;  %v1938_v5 = vpack.c.bf16 %v622_v3, %v621_v2  ;;  %v624_v6 = vld [vmem:[#allocation8 + $0x18] sm:$0xff]  ;;  %v625_v8 = vld [vmem:[#allocation8 + $0x20] sm:$0xff]  ;;  %s3186_s9 = sld [smem:[#allocation23_spill]]  ;;  %s3187_s10 = sld [smem:[#allocation25_spill]] }
  0xfd   : > { %1961 = vmatprep.subr.bf16.mxu1 %v2533_v0  ;;  %1724 = vmatprep.mubr.msk.f32.mxu1 %vm2534_vm0, %v2535_v1  ;;  %v1941_v7 = vpack.c.bf16 %v624_v6, %v623_v4  ;;  %v626_v9 = vld [vmem:[#allocation8 + $0x28] sm:$0xff]  ;;  %v770_v10 = vld [vmem:[#allocation7] sm:$0xff]  ;;  %v772_v12 = vld [vmem:[#allocation7 + $0x10] sm:$0xff]  ;;  %s3190_s2 = sld [smem:[#allocation30_spill]]  ;;  %s3191_s22 = sld [smem:[#allocation31_spill]] }
  0xfe   : > { %1939 = vmatpush3.bf16.msra.mxu0 %v1938_v5  ;;  %v771_v11 = vld [vmem:[#allocation7 + $0x8] sm:$0xff]  ;;  %v773_v13 = vld [vmem:[#allocation7 + $0x18] sm:$0xff]  ;;  %v1944_v14 = vpack.c.bf16 %v626_v9, %v625_v8  ;;  %v627_v16 = vld [vmem:[#allocation8 + $0x30] sm:$0xff]  ;;  %s618_s17 = scalar_lea.vmem [#allocation14], %s2892_s11  ;;  %s3192_s14 = sld [smem:[#allocation32_spill]] }
  0xff   : > { %1940 = vmatprep.subr.bf16.mxu0 %v2533_v0  ;;  %v2925_v15 = vpack.c.bf16 %v771_v11, %v770_v10  ;;  %v628_v17 = vld [vmem:[#allocation8 + $0x38] sm:$0xff]  ;;  %v2929_v18 = vpack.c.bf16 %v773_v13, %v772_v12  ;;  %v774_v19 = vld [vmem:[#allocation7 + $0x20] sm:$0xff]  ;;  %v775_v20 = vld [vmem:[#allocation7 + $0x28] sm:$0xff]  ;;  %s1348_s27 = sshll.u32 %s618_s17, 4  ;;  %s1335_s25 = scalar_lea.sflag [#allocation4], %s2889_s7  ;;  %s3090_s27 = int_to_ptr.vmem [resolvable:$true] %s1348_s27 }
 0x100   : > { %v1947_v21 = vpack.c.bf16 %v628_v17, %v627_v16  ;;  %v629_v22 = vld [vmem:[#allocation8 + $0x40] sm:$0xff]  ;;  %v630_v23 = vld [vmem:[#allocation8 + $0x48] sm:$0xff]  ;;  %v2934_v24 = vpack.c.bf16 %v775_v20, %v774_v19  ;;  %v776_v25 = vld [vmem:[#allocation7 + $0x30] sm:$0xff]  ;;  %s2440_s30 = scalar_lea.vmem %s3090_s27, 128  ;;  %p3193_p2 = scmp.ne.s32.totalorder %s3175_s15, 0 }
 0x101   : > { %1963 = vmatpush3.bf16.msra.mxu1 %v2925_v15  ;;  %v777_v26 = vld [vmem:[#allocation7 + $0x38] sm:$0xff]  ;;  %v1950_v27 = vpack.c.bf16 %v630_v23, %v629_v22  ;;  %v631_v28 = vld [vmem:[#allocation8 + $0x50] sm:$0xff]  ;;  %v778_v31 = vld [vmem:[#allocation7 + $0x40] sm:$0xff]  ;;  %p2441_p0 = scmp.ne.s32.totalorder %s3090_s27, %s2440_s30 }
 0x102   : > { %1942 = vmatpush3.bf16.msra.mxu0 %v1941_v7  ;;  %1964 = vmatprep.subr.bf16.mxu1 %v2533_v0  ;;  %v632_v29 = vld [vmem:[#allocation8 + $0x58] sm:$0xff]  ;;  %v2939_v30 = vpack.c.bf16 %v777_v26, %v776_v25  ;;  %v779_v32 = vld [vmem:[#allocation7 + $0x48] sm:$0xff]  ;;  %v633_v34 = vld [vmem:[#allocation8 + $0x60] sm:$0xff] }
 0x103   : > { %1943 = vmatprep.subr.bf16.mxu0 %v2533_v0  ;;  %v1953_v33 = vpack.c.bf16 %v632_v29, %v631_v28  ;;  %v634_v35 = vld [vmem:[#allocation8 + $0x68] sm:$0xff]  ;;  %v2944_v36 = vpack.c.bf16 %v779_v32, %v778_v31  ;;  %v780_v37 = vld [vmem:[#allocation7 + $0x50] sm:$0xff]  ;;  %v781_v38 = vld [vmem:[#allocation7 + $0x58] sm:$0xff]  ;;  %p2442_p6 = pnand %p2441_p0, %p3193_p2 }
 0x104   : > { %v1956_v39 = vpack.c.bf16 %v634_v35, %v633_v34  ;;  %v635_v40 = vld [vmem:[#allocation8 + $0x70] sm:$0xff]  ;;  %v636_v41 = vld [vmem:[#allocation8 + $0x78] sm:$0xff]  ;;  %v2949_v42 = vpack.c.bf16 %v781_v38, %v780_v37  ;;  %v782_v43 = vld [vmem:[#allocation7 + $0x60] sm:$0xff] }
 0x105   : > { %1966 = vmatpush3.bf16.msra.mxu1 %v2929_v18  ;;  %v783_v44 = vld [vmem:[#allocation7 + $0x68] sm:$0xff]  ;;  %v1959_v45 = vpack.c.bf16 %v636_v41, %v635_v40  ;;  %v620_v47 = vld [vmem:[%s547_s6] sm:$0xff]  ;;  %v1509_v51 = vld [vmem:[%s3136_s4] ss:$0 sm:$0xff]  ;;  %s3189_s6 = sld [smem:[#allocation29_spill]]  ;;  %p2443_p10 = pneg %p2442_p6 }
 0x106   : > { %1945 = vmatpush3.bf16.msra.mxu0 %v1944_v14  ;;  %1967 = vmatprep.subr.bf16.mxu1 %v2533_v0  ;;  %v2954_v46 = vpack.c.bf16 %v783_v44, %v782_v43  ;;  %v784_v48 = vld [vmem:[#allocation7 + $0x70] sm:$0xff]  ;;  %v785_v49 = vld [vmem:[#allocation7 + $0x78] sm:$0xff]  ;;  %v619_v52 = vld [vmem:[%s538_s23] sm:$0xff]  ;;  %s3188_s23 = sld [smem:[#allocation27_spill]] }
 0x107   : > { %1946 = vmatprep.subr.bf16.mxu0 %v2533_v0  ;;  %v2978_v50 = vpack.c.bf16 %v785_v49, %v784_v48  ;;  %v640_v57 = vld [vmem:[#allocation10] sm:$0xff]  ;;  %v641_v58 = vld [vmem:[#allocation10 + $0x8] sm:$0xff]  ;;  %v642_v59 = vld [vmem:[#allocation10 + $0x10] sm:$0xff] }
 0x108   : > { %v2010_v60 = vpack.c.bf16 %v641_v58, %v640_v57  ;;  %v643_v61 = vld [vmem:[#allocation10 + $0x18] sm:$0xff]  ;;  %v644_v63 = vld [vmem:[#allocation10 + $0x20] sm:$0xff]  ;;  %v645_v2 = vld [vmem:[#allocation10 + $0x28] sm:$0xff] }
 0x109   : > { %1969 = vmatpush3.bf16.msra.mxu1 %v2934_v24  ;;  %v2013_v62 = vpack.c.bf16 %v643_v61, %v642_v59  ;;  %v2016_v3 = vpack.c.bf16 %v645_v2, %v644_v63  ;;  %v646_v8 = vld [vmem:[#allocation10 + $0x30] sm:$0xff]  ;;  %v647_v9 = vld [vmem:[#allocation10 + $0x38] sm:$0xff]  ;;  %v648_v11 = vld [vmem:[#allocation10 + $0x40] sm:$0xff] }
 0x10a   : > { %1948 = vmatpush3.bf16.msra.mxu0 %v1947_v21  ;;  %1970 = vmatprep.subr.bf16.mxu1 %v2533_v0  ;;  %v2019_v10 = vpack.c.bf16 %v647_v9, %v646_v8  ;;  %v649_v12 = vld [vmem:[#allocation10 + $0x48] sm:$0xff]  ;;  %v650_v14 = vld [vmem:[#allocation10 + $0x50] sm:$0xff]  ;;  %v651_v16 = vld [vmem:[#allocation10 + $0x58] sm:$0xff] }
 0x10b   : > { %1949 = vmatprep.subr.bf16.mxu0 %v2533_v0  ;;  %v2022_v13 = vpack.c.bf16 %v649_v12, %v648_v11  ;;  %v2025_v17 = vpack.c.bf16 %v651_v16, %v650_v14  ;;  %v652_v19 = vld [vmem:[#allocation10 + $0x60] sm:$0xff]  ;;  %v653_v20 = vld [vmem:[#allocation10 + $0x68] sm:$0xff]  ;;  %v654_v22 = vld [vmem:[#allocation10 + $0x70] sm:$0xff] }
 0x10c   : > { %v2028_v21 = vpack.c.bf16 %v653_v20, %v652_v19  ;;  %v655_v23 = vld [vmem:[#allocation10 + $0x78] sm:$0xff]  ;;  %v657_v26 = vld [vmem:[#allocation11] sm:$0xff]  ;;  %v659_v28 = vld [vmem:[#allocation11 + $0x10] sm:$0xff] }
 0x10d   : > { %1972 = vmatpush3.bf16.msra.mxu1 %v2939_v30  ;;  %v2031_v25 = vpack.c.bf16 %v655_v23, %v654_v22  ;;  %v660_v31 = vld [vmem:[#allocation11 + $0x18] sm:$0xff]  ;;  %v662_v34 = vld [vmem:[#allocation11 + $0x28] sm:$0xff]  ;;  %v663_v37 = vld [vmem:[#allocation11 + $0x30] sm:$0xff] }
 0x10e   : > { %1951 = vmatpush3.bf16.msra.mxu0 %v1950_v27  ;;  %1973 = vmatprep.subr.bf16.mxu1 %v2533_v0  ;;  %v658_v27 = vld [vmem:[#allocation11 + $0x8] sm:$0xff]  ;;  %v2037_v32 = vpack.c.bf16 %v660_v31, %v659_v28  ;;  %v664_v38 = vld [vmem:[#allocation11 + $0x38] sm:$0xff]  ;;  %v665_v40 = vld [vmem:[#allocation11 + $0x40] sm:$0xff] }
 0x10f   : > { %1952 = vmatprep.subr.bf16.mxu0 %v2533_v0  ;;  %v2034_v29 = vpack.c.bf16 %v658_v27, %v657_v26  ;;  %v666_v41 = vld [vmem:[#allocation11 + $0x48] sm:$0xff]  ;;  %v667_v44 = vld [vmem:[#allocation11 + $0x50] sm:$0xff]  ;;  %v669_v48 = vld [vmem:[#allocation11 + $0x60] sm:$0xff] }
 0x110   : > { %v2046_v43 = vpack.c.bf16 %v666_v41, %v665_v40  ;;  %v670_v49 = vld [vmem:[#allocation11 + $0x68] sm:$0xff]  ;;  %v1511_v58 = vld [vmem:[%s3186_s9] ss:$0 sm:$0xff]  ;;  %v671_v61 = vld [vmem:[#allocation11 + $0x70] sm:$0xff]  ;;  %s1518_s9 = sshll.u32 %s2638_s24, 7  ;;  %s2536_s24 = smov [#allocation14]  }
 0x111   : > { %1975 = vmatpush3.bf16.msra.mxu1 %v2944_v36  ;;  %v674_v2 = vld [vmem:[#allocation13] sm:$0xff]  ;;  %v679_v9 = vld [vmem:[#allocation13 + $0x28] sm:$0xff]  ;;  %v680_v11 = vld [vmem:[#allocation13 + $0x30] sm:$0xff]  ;;  %s2444_s11 = sshll.u32 %s2536_s24, 4  ;;  %s2445_s11 = int_to_ptr.vmem [resolvable:$false] %s2444_s11 }
 0x112   : > { %1954 = vmatpush3.bf16.msra.mxu0 %v1953_v33  ;;  %1976 = vmatprep.subr.bf16.mxu1 %v2533_v0  ;;  %v661_v33 = vld [vmem:[#allocation11 + $0x20] sm:$0xff]  ;;  %v681_v12 = vld [vmem:[#allocation13 + $0x38] sm:$0xff]  ;;  %v683_v16 = vld [vmem:[#allocation13 + $0x48] sm:$0xff]  ;;  %p2447_p5 = scmp.lt.s32.totalorder %s3090_s27, %s2445_s11 }
 0x113   : > { %1955 = vmatprep.subr.bf16.mxu0 %v2533_v0  ;;  %v2040_v35 = vpack.c.bf16 %v662_v34, %v661_v33  ;;  %v678_v8 = vld [vmem:[#allocation13 + $0x20] sm:$0xff]  ;;  %v684_v19 = vld [vmem:[#allocation13 + $0x50] sm:$0xff]  ;;  %v685_v20 = vld [vmem:[#allocation13 + $0x58] sm:$0xff] }
 0x114   : > { %v682_v14 = vld [vmem:[#allocation13 + $0x40] sm:$0xff]  ;;  %v687_v23 = vld [vmem:[#allocation13 + $0x68] sm:$0xff]  ;;  %v689_v33 = vld [vmem:[#allocation13 + $0x78] sm:$0xff] }
 0x115   : > { %1978 = vmatpush3.bf16.msra.mxu1 %v2949_v42  ;;  %v686_v22 = vld [vmem:[#allocation13 + $0x60] sm:$0xff] }
 0x116   : > { %1957 = vmatpush3.bf16.msra.mxu0 %v1956_v39  ;;  %1979 = vmatprep.subr.bf16.mxu1 %v2533_v0  ;;  %v2043_v39 = vpack.c.bf16 %v664_v38, %v663_v37  ;;  %v1512_v26 = vld [vmem:[%s3187_s10] ss:$0 sm:$0xff] }
 0x117   : > { %1958 = vmatprep.subr.bf16.mxu0 %v2533_v0 }
 0x119   : > { %1981 = vmatpush3.bf16.msra.mxu1 %v2954_v46 }
 0x11a   : > { %1960 = vmatpush3.bf16.msra.mxu0 %v1959_v45  ;;  %1982 = vmatprep.subr.bf16.mxu1 %v2533_v0  ;;  %v668_v45 = vld [vmem:[#allocation11 + $0x58] sm:$0xff] }
 0x11b   : > { %1985 = vmatprep.subr.bf16.mxu0 %v2533_v0 }
 0x11d   : > { %1690 = vmatmul.mubr.f32.vlgmr.msra.gmra.mrb[0].mxu0 %v620_v47  ;;  %1984 = vmatpush3.bf16.msra.mxu1 %v2978_v50  ;;  %v2049_v47 = vpack.c.bf16 %v668_v45, %v667_v44  ;;  %v1515_v45 = vld [vmem:[%s3190_s2] ss:$0 sm:$0xff] }
 0x11e   : > { %1987 = vmatpush3.bf16.msra.mxu0 %v2925_v15  ;;  %1759 = vmatprep.mubr.msk.f32.mxu0 %vm2534_vm0, %v2535_v1 }
 0x11f   : > { %1988 = vmatprep.subr.bf16.mxu0 %v2533_v0  ;;  %2009 = vmatprep.subr.bf16.mxu1 %v2533_v0 }
 0x122   : > { %1990 = vmatpush3.bf16.msra.mxu0 %v2929_v18 }
 0x123   : > { %1991 = vmatprep.subr.bf16.mxu0 %v2533_v0 }
 0x126   : > { %1993 = vmatpush3.bf16.msra.mxu0 %v2934_v24 }
 0x127   : > { %1994 = vmatprep.subr.bf16.mxu0 %v2533_v0 }
 0x12a   : > { %1996 = vmatpush3.bf16.msra.mxu0 %v2939_v30 }
 0x12b   : > { %1997 = vmatprep.subr.bf16.mxu0 %v2533_v0 }
 0x12e   : > { %1999 = vmatpush3.bf16.msra.mxu0 %v2944_v36 }
 0x12f   : > { %2000 = vmatprep.subr.bf16.mxu0 %v2533_v0 }
 0x132   : > { %2002 = vmatpush3.bf16.msra.mxu0 %v2949_v42 }
 0x133   : > { %2003 = vmatprep.subr.bf16.mxu0 %v2533_v0 }
 0x136   : > { %2005 = vmatpush3.bf16.msra.mxu0 %v2954_v46 }
 0x137   : > { %2006 = vmatprep.subr.bf16.mxu0 %v2533_v0 }
 0x13a   : > { %2008 = vmatpush3.bf16.msra.mxu0 %v2978_v50 }
 0x13b   : > { %2033 = vmatprep.subr.bf16.mxu0 %v2533_v0 }
 0x1f0   : > { %v765_v53 = vpop.f32.mrb[0].mxu0 }
 0x1f1   : > { %v766_v54 = vadd.f32 %v1509_v51, %v765_v53  ;;  %v1691_v55 = vpop.f32.mrb[1].mxu0  ;;  %v2052_v51 = vpack.c.bf16 %v670_v49, %v669_v48  ;;  %v1516_v48 = vld [vmem:[%s3191_s22] ss:$0 sm:$0xff] }
 0x1f3   : > { %v769_v56 = vadd.f32 %v766_v54, %v619_v52 }
 0x1f5   : > { %1725 = vmatmul.mubr.f32.vlgmr.msra.gmra.mrb[0].mxu1 %v769_v56 }
 0x1f6   : > { %1794 = vmatprep.mubr.msk.f32.mxu1 %vm2534_vm0, %v2535_v1  ;;  %2011 = vmatpush3.bf16.msra.mxu1 %v2010_v60 }
 0x1f7   : > { %2012 = vmatprep.subr.bf16.mxu1 %v2533_v0 }
 0x1fa   : > { %2014 = vmatpush3.bf16.msra.mxu1 %v2013_v62  ;;  %v672_v62 = vld [vmem:[#allocation11 + $0x78] sm:$0xff] }
 0x1fb   : > { %2015 = vmatprep.subr.bf16.mxu1 %v2533_v0  ;;  %v2055_v63 = vpack.c.bf16 %v672_v62, %v671_v61 }
 0x1fe   : > { %2017 = vmatpush3.bf16.msra.mxu1 %v2016_v3  ;;  %v675_v3 = vld [vmem:[#allocation13 + $0x8] sm:$0xff] }
 0x1ff   : > { %2018 = vmatprep.subr.bf16.mxu1 %v2533_v0 }
 0x202   : > { %2020 = vmatpush3.bf16.msra.mxu1 %v2019_v10  ;;  %v2064_v10 = vpack.c.bf16 %v679_v9, %v678_v8 }
 0x203   : > { %2021 = vmatprep.subr.bf16.mxu1 %v2533_v0 }
 0x206   : > { %2023 = vmatpush3.bf16.msra.mxu1 %v2022_v13  ;;  %v2067_v13 = vpack.c.bf16 %v681_v12, %v680_v11 }
 0x207   : > { %2024 = vmatprep.subr.bf16.mxu1 %v2533_v0 }
 0x20a   : > { %2026 = vmatpush3.bf16.msra.mxu1 %v2025_v17  ;;  %v2070_v17 = vpack.c.bf16 %v683_v16, %v682_v14 }
 0x20b   : > { %2027 = vmatprep.subr.bf16.mxu1 %v2533_v0 }
 0x20e   : > { %2029 = vmatpush3.bf16.msra.mxu1 %v2028_v21  ;;  %v2073_v21 = vpack.c.bf16 %v685_v20, %v684_v19 }
 0x20f   : > { %2030 = vmatprep.subr.bf16.mxu1 %v2533_v0 }
 0x212   : > { %2032 = vmatpush3.bf16.msra.mxu1 %v2031_v25  ;;  %v2076_v25 = vpack.c.bf16 %v687_v23, %v686_v22 }
 0x213   : > { %2057 = vmatprep.subr.bf16.mxu1 %v2533_v0 }
 0x2c8   : > { %v852_v4 = vpop.f32.mrb[0].mxu1 }
 0x2c9   : > { %v2994_v5 = vsub.f32 %v769_v56, %v852_v4  ;;  %v1726_v6 = vpop.f32.mrb[1].mxu1  ;;  %v1510_v56 = vld [vmem:[%s3137_s5] ss:$0 sm:$0xff]  ;;  %v676_v4 = vld [vmem:[#allocation13 + $0x10] sm:$0xff] }
 0x2ca   : > { %v677_v6 = vld [vmem:[#allocation13 + $0x18] sm:$0xff] }
 0x2cb   : > { %v857_v7 = vmul.f32 %v2994_v5, %v2994_v5 }
 0x2cd   : > { %1760 = vmatmul.mubr.f32.vlgmr.msra.gmra.mrb[2].mxu0 %v857_v7  ;;  %v2061_v7 = vpack.c.bf16 %v677_v6, %v676_v4 }
 0x2ce   : > { %1829 = vmatprep.mubr.msk.f32.mxu0 %vm2534_vm0, %v2535_v1  ;;  %2035 = vmatpush3.bf16.msra.mxu0 %v2034_v29 }
 0x2cf   : > { %2036 = vmatprep.subr.bf16.mxu0 %v2533_v0 }
 0x2d2   : > { %2038 = vmatpush3.bf16.msra.mxu0 %v2037_v32  ;;  %v688_v32 = vld [vmem:[#allocation13 + $0x70] sm:$0xff] }
 0x2d3   : > { %2039 = vmatprep.subr.bf16.mxu0 %v2533_v0  ;;  %v2079_v34 = vpack.c.bf16 %v689_v33, %v688_v32 }
 0x2d6   : > { %2041 = vmatpush3.bf16.msra.mxu0 %v2040_v35  ;;  %v1513_v35 = vld [vmem:[%s3188_s23] ss:$0 sm:$0xff]  ;;  %s3088_s23 = scalar_lea.hbm %s3192_s14, %s1518_s9 }
 0x2d7   : > { %2042 = vmatprep.subr.bf16.mxu0 %v2533_v0 }
 0x2da   : > { %2044 = vmatpush3.bf16.msra.mxu0 %v2043_v39 }
 0x2db   : > { %2045 = vmatprep.subr.bf16.mxu0 %v2533_v0 }
 0x2de   : > { %2047 = vmatpush3.bf16.msra.mxu0 %v2046_v43 }
 0x2df   : > { %2048 = vmatprep.subr.bf16.mxu0 %v2533_v0 }
 0x2e2   : > { %2050 = vmatpush3.bf16.msra.mxu0 %v2049_v47 }
 0x2e3   : > { %2051 = vmatprep.subr.bf16.mxu0 %v2533_v0 }
 0x2e6   : > { %2053 = vmatpush3.bf16.msra.mxu0 %v2052_v51 }
 0x2e7   : > { %2054 = vmatprep.subr.bf16.mxu0 %v2533_v0 }
 0x2ea   : > { %2056 = vmatpush3.bf16.msra.mxu0 %v2055_v63 }
 0x2eb   : > { %2081 = vmatprep.subr.bf16.mxu0 %v2533_v0 }
 0x3a0   : > { %v924_v52 = vpop.f32.mrb[2].mxu0 }
 0x3a1   : > { %v925_v53 = vadd.f32 1e-05, %v924_v52  ;;  %v1761_v54 = vpop.f32.mrb[3].mxu0 }
 0x3a3   : > { %2236 = vrsqrt.f32 %v925_v53 }
 0x3ad   : > { %v2237_v55 = vpop.eup %2236 }
 0x3ae   : > { %v929_v57 = vmul.f32 %v2237_v55, %v2994_v5  ;;  %v2058_v5 = vpack.c.bf16 %v675_v3, %v674_v2 }
 0x3b0   : > { %v936_v59 = vmul.f32 %v1510_v56, %v929_v57 }
 0x3b2   : > { %v3019_v60 = vadd.f32 %v1511_v58, %v936_v59 }
 0x3b4   : > { %1795 = vmatmul.mubr.f32.vlgmr.msra.gmra.mrb[2].mxu1 %v3019_v60 }
 0x3b5   : > { %1864 = vmatprep.mubr.msk.f32.mxu1 %vm2534_vm0, %v2535_v1  ;;  %2059 = vmatpush3.bf16.msra.mxu1 %v2058_v5 }
 0x3b6   : > { %2060 = vmatprep.subr.bf16.mxu1 %v2533_v0 }
 0x3b9   : > { %2062 = vmatpush3.bf16.msra.mxu1 %v2061_v7 }
 0x3ba   : > { %2063 = vmatprep.subr.bf16.mxu1 %v2533_v0 }
 0x3bd   : > { %2065 = vmatpush3.bf16.msra.mxu1 %v2064_v10 }
 0x3be   : > { %2066 = vmatprep.subr.bf16.mxu1 %v2533_v0 }
 0x3c1   : > { %2068 = vmatpush3.bf16.msra.mxu1 %v2067_v13 }
 0x3c2   : > { %2069 = vmatprep.subr.bf16.mxu1 %v2533_v0 }
 0x3c5   : > { %2071 = vmatpush3.bf16.msra.mxu1 %v2070_v17 }
 0x3c6   : > { %2072 = vmatprep.subr.bf16.mxu1 %v2533_v0 }
 0x3c9   : > { %2074 = vmatpush3.bf16.msra.mxu1 %v2073_v21 }
 0x3ca   : > { %2075 = vmatprep.subr.bf16.mxu1 %v2533_v0 }
 0x3cd   : > { %2077 = vmatpush3.bf16.msra.mxu1 %v2076_v25 }
 0x3ce   : > { %2078 = vmatprep.subr.bf16.mxu1 %v2533_v0 }
 0x3d1   : > { %2080 = vmatpush3.bf16.msra.mxu1 %v2079_v34 }
 0x3d2   : > { %2105 = vmatprep.subr.bf16.mxu1 %v2533_v0 }
 0x487   : > { %v1016_v27 = vpop.f32.mrb[2].mxu1 }
 0x488   : > { %v1017_v28 = vadd.f32 %v1512_v26, %v1016_v27  ;;  %v1796_v29 = vpop.f32.mrb[3].mxu1 }
 0x48a   : > { %v1020_v31 = vmax.f32 %v1017_v28, 0.0 }
 0x48c   : > { %1830 = vmatmul.mubr.f32.vlgmr.msra.gmra.mrb[4].mxu0 %v1020_v31 }
 0x48d   : > { %2083 = vmatpush3.bf16.msra.mxu0 %v2925_v15  ;;  %1899 = vmatprep.mubr.msk.f32.mxu0 %vm2534_vm0, %v2535_v1 }
 0x48e   : > { %2084 = vmatprep.subr.bf16.mxu0 %v2533_v0 }
 0x491   : > { %2086 = vmatpush3.bf16.msra.mxu0 %v2929_v18 }
 0x492   : > { %2087 = vmatprep.subr.bf16.mxu0 %v2533_v0 }
 0x495   : > { %2089 = vmatpush3.bf16.msra.mxu0 %v2934_v24 }
 0x496   : > { %2090 = vmatprep.subr.bf16.mxu0 %v2533_v0 }
 0x499   : > { %2092 = vmatpush3.bf16.msra.mxu0 %v2939_v30 }
 0x49a   : > { %2093 = vmatprep.subr.bf16.mxu0 %v2533_v0 }
 0x49d   : > { %2095 = vmatpush3.bf16.msra.mxu0 %v2944_v36 }
 0x49e   : > { %2096 = vmatprep.subr.bf16.mxu0 %v2533_v0 }
 0x4a1   : > { %2098 = vmatpush3.bf16.msra.mxu0 %v2949_v42 }
 0x4a2   : > { %2099 = vmatprep.subr.bf16.mxu0 %v2533_v0 }
 0x4a5   : > { %2101 = vmatpush3.bf16.msra.mxu0 %v2954_v46 }
 0x4a6   : > { %2102 = vmatprep.subr.bf16.mxu0 %v2533_v0 }
 0x4a9   : > { %2104 = vmatpush3.bf16.msra.mxu0 %v2978_v50 }
 0x55f   : > { %v1093_v37 = vpop.f32.mrb[4].mxu0 }
 0x560   : > { %v1094_v38 = vadd.f32 %v1513_v35, %v1093_v37  ;;  %v1831_v39 = vpop.f32.mrb[5].mxu0 }
 0x562   : > { %v1097_v40 = vmax.f32 %v1094_v38, 0.0 }
 0x564   : > { %1865 = vmatmul.mubr.f32.vlgmr.msra.gmra.mrb[4].mxu1 %v1097_v40 }
 0x565   : > { %2107 = vmatpush3.bf16.msra.mxu1 %v2925_v15  ;;  %1934 = vmatprep.mubr.msk.f32.mxu1 %vm2534_vm0, %v2535_v1  ;;  %v1514_v1 = vld [vmem:[%s3189_s6] ss:$0 sm:$0xff]  ;;  %s2446_s6 = scalar_lea.vmem %s2445_s11, 256 }
 0x566   : > { %2108 = vmatprep.subr.bf16.mxu1 %v2533_v0  ;;  %p2448_p9 = scmp.lt.s32.totalorder %s2446_s6, %s2440_s30 }
 0x568   : > { %p2449_p3 = por %p2448_p9, %p2447_p5 }
 0x569   : > { %2110 = vmatpush3.bf16.msra.mxu1 %v2929_v18 }
 0x56a   : > { %2111 = vmatprep.subr.bf16.mxu1 %v2533_v0  ;;  %p2450_p7 = pnand %p2449_p3, %p2443_p10 }
 0x56d   : > { %2113 = vmatpush3.bf16.msra.mxu1 %v2934_v24 }
 0x56e   : > { %2114 = vmatprep.subr.bf16.mxu1 %v2533_v0 }
 0x571   : > { %2116 = vmatpush3.bf16.msra.mxu1 %v2939_v30 }
 0x572   : > { %2117 = vmatprep.subr.bf16.mxu1 %v2533_v0 }
 0x575   : > { %2119 = vmatpush3.bf16.msra.mxu1 %v2944_v36 }
 0x576   : > { %2120 = vmatprep.subr.bf16.mxu1 %v2533_v0 }
 0x579   : > { %2122 = vmatpush3.bf16.msra.mxu1 %v2949_v42 }
 0x57a   : > { %2123 = vmatprep.subr.bf16.mxu1 %v2533_v0 }
 0x57d   : > { %2125 = vmatpush3.bf16.msra.mxu1 %v2954_v46 }
 0x57e   : > { %2126 = vmatprep.subr.bf16.mxu1 %v2533_v0 }
 0x581   : > { %2128 = vmatpush3.bf16.msra.mxu1 %v2978_v50 }
 0x637   : > { %v1170_v15 = vpop.f32.mrb[4].mxu1 }
 0x638   : > { %v1171_v18 = vadd.f32 %v1514_v1, %v1170_v15  ;;  %v1866_v24 = vpop.f32.mrb[5].mxu1 }
 0x63a   : > { %v1174_v30 = vadd.f32 %v1171_v18, %v3019_v60 }
 0x63c   : > { %1900 = vmatmul.mubr.f32.vlgmr.msra.gmra.mrb[6].mxu0 %v1174_v30 }
 0x70f   : > { %v1241_v36 = vpop.f32.mrb[6].mxu0 }
 0x710   : > { %v1245_v42 = vsub.f32 %v1174_v30, %v1241_v36  ;;  %v1901_v41 = vpop.f32.mrb[7].mxu0 }
 0x712   : > { %v1246_v46 = vmul.f32 %v1245_v42, %v1245_v42 }
 0x714   : > { %1935 = vmatmul.mubr.f32.vlgmr.msra.gmra.mrb[6].mxu1 %v1246_v46 }
 0x7e7   : > { %v1313_v0 = vpop.f32.mrb[6].mxu1 }
 0x7e8   : > { %v1314_v50 = vadd.f32 1e-05, %v1313_v0  ;;  %v1936_v43 = vpop.f32.mrb[7].mxu1 }
 0x7ea   : > { %2238 = vrsqrt.f32 %v1314_v50 }
 0x7f4   : > { %v2239_v44 = vpop.eup %2238 }
 0x7f5   : > { %v1318_v47 = vmul.f32 %v2239_v44, %v1245_v42 }
 0x7f7   : > { %v1325_v49 = vmul.f32 %v1515_v45, %v1318_v47 }
 0x7f9   : > { %v1332_v51 = vadd.f32 %v1516_v48, %v1325_v49 }
 0x7fb   : > { %1333 = vst [vmem:[%s618_s17] sm:$0xff] %v1332_v51 }
 0x7fc   : > { %2453 = shalt.err (!%p2450_p7)
}
 0x7fd   : > { %s2454_s7 = scalar_lea.hbm %s3088_s23, 128  ;;  %s2458_s2 = scalar_lea.hbm %s3192_s14, 256 }
 0x7fe   : > { %p2455_p11 = scmp.ne.s32.totalorder %s3088_s23, %s2454_s7  ;;  %p2459_p12 = scmp.lt.u32.totalorder %s3088_s23, %s3192_s14 }
 0x7ff   : > { %p2460_p1 = scmp.lt.u32.totalorder %s2458_s2, %s2454_s7  ;;  %p2462_p0 = scmp.lt.u32.totalorder %s2454_s7, %s3088_s23 }
 0x800   : > { %p2456_p8 = pnand %p2455_p11, %p3193_p2 }
 0x801   : > { %p2461_p13 = por %p2460_p1, %p2459_p12 }
 0x802   : > { %p2457_p4 = pneg %p2456_p8 }
 0x803   : > { %p2463_p6 = por %p2462_p0, %p2461_p13 }
 0x805   : > { %p2464_p10 = pnand %p2463_p6, %p2457_p4 }
 0x807   : > { %2467 = shalt.err (!%p2464_p10)
}
 0x808   : > { %2153 = dma.vmem_to_hbm [thread:$0]  (%p3193_p2), %s3090_s27, 128, %s3088_s23, %s1335_s25  }
 0x809 PF: > { %s1360_s22 = sand.u32 1, %s2510_s18   ;;  %p3194_p5 = scmp.ne.s32.totalorder %s3176_s16, 0 }
 0x80a   : > { %p3195_p9 = scmp.ge.s32.totalorder %s2522_s21, 2  ;;  %s1361_s9 = scalar_lea.sflag [#allocation4], %s1360_s22 }
 0x80c   : > { %p2179_p3 = pnand %p3195_p9, %p3194_p5 }
 0x80e   : > { %2505 = dma.done.wait (!%p2179_p3), %s1361_s9, 128  }
 0x80f   : > { %2507 = vsyncadd (!%p2179_p3), %s1361_s9, 4294967168  ;;  %p33_p7 = scmp.ge.s32.totalorder %s2790_s26, 4   ;;  %s3196_s18 = smov %s2514_s19 }
 0x810   : > { %s3197_s19 = smov %s2518_s20  ;;  %s3198_s20 = smov %s2802_s8 }
 0x811   : > { %s3199_s21 = smov %s2790_s26  ;;  %35 = sbr.rel (!%p33_p7) target bundleno = 22 (0x16), region = 158 }
 0x818   :  { %1366 = vsyncpa [#allocation3], 1 }
 0x819   :  { %1368 = vsyncpa [#allocation3 + $0x1], 1 }
 0x81a   :  { %1369 = vsyncpa [#allocation6], 1 }
 0x81b   :  { %1371 = vsyncpa [#allocation6 + $0x1], 1 }
 0x81c   :  { %1372 = vsyncpa [#allocation9], 1 }
 0x81d   :  { %1373 = vsyncpa [#allocation12], 1 }
 0x81e   :  { %1374 = vsyncpa [#allocation4], 1 }
 0x81f   :  { %1376 = vsyncpa [#allocation4 + $0x1], 1 }

</bundles_post_ra>
